<compile_context>
chip_gen: v5e
topology: v5e:2x2
jax: 0.10.0
libtpu: 0.0.40
codegen_flags: <defaults>
</compile_context>

<pallas_src>
import functools

import jax
import jax.numpy as jnp
from jax import lax
from jax.experimental import pallas as pl
from jax.experimental.pallas import tpu as pltpu

LANE = 128      # lanes per vreg
SUB = 8         # sublanes per vreg
CHUNK = SUB     # rows (sublanes) processed per inner-loop chunk = one vreg slab

IN_F, HID, OUT_F = 2, 10, 2


def mlp_kernel(x_ref, w1_ref, b1_ref, w2_ref, b2_ref, w3_ref, b3_ref, o_ref):
    """x_ref/o_ref: (feat, rows, 128) VMEM tiles; weights/biases: SMEM scalars."""
    # Hoist every scalar load out of the chunk loop (one sreg load each per
    # grid step; they splat into vregs for free on the scalar path).
    W1 = [[w1_ref[o, i] for i in range(IN_F)] for o in range(HID)]
    B1 = [b1_ref[o] for o in range(HID)]
    W2 = [[w2_ref[o, i] for i in range(HID)] for o in range(HID)]
    B2 = [b2_ref[o] for o in range(HID)]
    W3 = [[w3_ref[o, i] for i in range(HID)] for o in range(OUT_F)]
    B3 = [b3_ref[o] for o in range(OUT_F)]

    rows = x_ref.shape[1]          # static block size, multiple of CHUNK
    n_chunks = rows // CHUNK

    def chunk(c, carry):
        r = pl.multiple_of(c * CHUNK, CHUNK)
        x0 = x_ref[0, pl.ds(r, CHUNK), :]          # (8, 128) full-density slab
        x1 = x_ref[1, pl.ds(r, CHUNK), :]

        # Layer 1: 2 -> 10, scalar-weight FMAs, ReLU.
        h1 = [jnp.maximum(W1[o][0] * x0 + W1[o][1] * x1 + B1[o], 0.0)
              for o in range(HID)]

        # Layer 2: 10 -> 10.
        h2 = []
        for o in range(HID):
            acc = W2[o][0] * h1[0]
            for i in range(1, HID):
                acc = acc + W2[o][i] * h1[i]
            h2.append(jnp.maximum(acc + B2[o], 0.0))

        # Layer 3: 10 -> 2 (final ReLU per the PyTorch spec).
        for o in range(OUT_F):
            acc = W3[o][0] * h2[0]
            for i in range(1, HID):
                acc = acc + W3[o][i] * h2[i]
            o_ref[o, pl.ds(r, CHUNK), :] = jnp.maximum(acc + B3[o], 0.0)
        return carry

    lax.fori_loop(0, n_chunks, chunk, 0)


@functools.partial(jax.jit, static_argnames=("tb",))
def simple_nn_forward(x, params, *, tb=32768):
    """x: (B, 2) f32 (PyTorch layout).  Returns (B, 2) f32.

    tb = batch lanes per grid step; must be a multiple of 1024 (8 x 128).
    """
    assert tb % (SUB * LANE) == 0
    B = x.shape[0]

    # Batch -> (sublane, lane): (B,2) -> (2,B) -> pad to mult of 1024 -> (2, rows, 128).
    b_pad = pl.cdiv(B, SUB * LANE) * (SUB * LANE)
    xt = x.T                                            # (2, B)
    if b_pad != B:
        xt = jnp.pad(xt, ((0, 0), (0, b_pad - B)))      # <= 1023 extra elems
    rows = b_pad // LANE                                # multiple of 8
    x3 = xt.reshape(IN_F, rows, LANE)

    # Rows per grid step.  Keep it a multiple of 8; prefer >= 2 grid steps when
    # there is enough batch so v7x's two TensorCores both get work.  Ragged
    # tails are handled by a partial final block (masked store).
    rpt = min(tb // LANE, rows)
    if rpt >= rows and rows >= 2 * SUB:
        rpt = ((rows // 2 + SUB - 1) // SUB) * SUB
    grid = pl.cdiv(rows, rpt)

    smem = pl.BlockSpec(memory_space=pltpu.MemorySpace.SMEM)

    out3 = pl.pallas_call(
        mlp_kernel,
        out_shape=jax.ShapeDtypeStruct((OUT_F, rows, LANE), jnp.float32),
        grid=(grid,),
        in_specs=[
            pl.BlockSpec((IN_F, rpt, LANE), lambda i: (0, i, 0)),   # x tile
            smem,   # w1 (10, 2)
            smem,   # b1 (10,)
            smem,   # w2 (10, 10)
            smem,   # b2 (10,)
            smem,   # w3 (2, 10)
            smem,   # b3 (2,)
        ],
        out_specs=pl.BlockSpec((OUT_F, rpt, LANE), lambda i: (0, i, 0)),
        compiler_params=pltpu.CompilerParams(
            dimension_semantics=("parallel",)),          # megacore on v7x
    )(x3, params["w1"], params["b1"], params["w2"], params["b2"],
      params["w3"], params["b3"])

    return out3.reshape(OUT_F, b_pad)[:, :B].T           # back to (B, 2)


def init_params(key):
    """PyTorch-style init: U(-1/sqrt(fan_in), 1/sqrt(fan_in)); weights kept in
    PyTorch (out, in) layout, biases as flat (out,) vectors."""
    ks = jax.random.split(key, 6)

    def unif(k, shape, fan_in):
        bound = 1.0 / jnp.sqrt(fan_in)
        return jax.random.uniform(k, shape, jnp.float32, -bound, bound)

    return {
        "w1": unif(ks[0], (HID, IN_F), float(IN_F)),  "b1": unif(ks[1], (HID,), float(IN_F)),
        "w2": unif(ks[2], (HID, HID), float(HID)),    "b2": unif(ks[3], (HID,), float(HID)),
        "w3": unif(ks[4], (OUT_F, HID), float(HID)),  "b3": unif(ks[5], (OUT_F,), float(HID)),
    }


def reference_forward(x, p):
    h = jnp.maximum(x @ p["w1"].T + p["b1"], 0.0)
    h = jnp.maximum(h @ p["w2"].T + p["b2"], 0.0)
    h = jnp.maximum(h @ p["w3"].T + p["b3"], 0.0)
    return h


if __name__ == "__main__":
    key = jax.random.PRNGKey(0)
    k_x, k_p = jax.random.split(key)
    # Small batch; not a multiple of 1024, so it exercises the pad, the
    # two-step grid, and the partial (masked) final block.
    B = 2500
    x = jax.random.normal(k_x, (B, IN_F), dtype=jnp.float32)
    params = init_params(k_p)

    out = jax.block_until_ready(simple_nn_forward(x, params))

    ref = reference_forward(x, params)
    assert out.shape == (B, OUT_F)
    assert jnp.allclose(out, ref, atol=1e-5, rtol=1e-5)
    print("KERNEL_OK")
</pallas_src>

<mosaic_0001>
module attributes {stable_mosaic.version = 11 : i64} {
  func.func @mlp_kernel(%arg0: i32, %arg1: memref<2x16x128xf32, #tpu.memory_space<vmem>>, %arg2: memref<10x2xf32, #tpu.memory_space<smem>>, %arg3: memref<10xf32, #tpu.memory_space<smem>>, %arg4: memref<10x10xf32, #tpu.memory_space<smem>>, %arg5: memref<10xf32, #tpu.memory_space<smem>>, %arg6: memref<2x10xf32, #tpu.memory_space<smem>>, %arg7: memref<2xf32, #tpu.memory_space<smem>>, %arg8: memref<2x16x128xf32, #tpu.memory_space<vmem>>) attributes {dimension_semantics = [#tpu.dimension_semantics<parallel>], iteration_bounds = array<i64: 2>, scalar_prefetch = 0 : i64, scratch_operands = 0 : i64, tpu.core_type = #tpu.core_type<tc>, window_params = [{transform_indices = @transform_0, window_bounds = array<i64: 2, 16, 128>}, {transform_indices = @transform_1, window_bounds = array<i64: 10, 2>}, {transform_indices = @transform_2, window_bounds = array<i64: 10>}, {transform_indices = @transform_3, window_bounds = array<i64: 10, 10>}, {transform_indices = @transform_4, window_bounds = array<i64: 10>}, {transform_indices = @transform_5, window_bounds = array<i64: 2, 10>}, {transform_indices = @transform_6, window_bounds = array<i64: 2>}, {transform_indices = @transform_7, window_bounds = array<i64: 2, 16, 128>}]} {
    %c0 = arith.constant 0 : index
    %c0_0 = arith.constant 0 : index
    %0 = memref.load %arg2[%c0, %c0_0] : memref<10x2xf32, #tpu.memory_space<smem>>
    %c0_1 = arith.constant 0 : index
    %c1 = arith.constant 1 : index
    %1 = memref.load %arg2[%c0_1, %c1] : memref<10x2xf32, #tpu.memory_space<smem>>
    %c1_2 = arith.constant 1 : index
    %c0_3 = arith.constant 0 : index
    %2 = memref.load %arg2[%c1_2, %c0_3] : memref<10x2xf32, #tpu.memory_space<smem>>
    %c1_4 = arith.constant 1 : index
    %c1_5 = arith.constant 1 : index
    %3 = memref.load %arg2[%c1_4, %c1_5] : memref<10x2xf32, #tpu.memory_space<smem>>
    %c2 = arith.constant 2 : index
    %c0_6 = arith.constant 0 : index
    %4 = memref.load %arg2[%c2, %c0_6] : memref<10x2xf32, #tpu.memory_space<smem>>
    %c2_7 = arith.constant 2 : index
    %c1_8 = arith.constant 1 : index
    %5 = memref.load %arg2[%c2_7, %c1_8] : memref<10x2xf32, #tpu.memory_space<smem>>
    %c3 = arith.constant 3 : index
    %c0_9 = arith.constant 0 : index
    %6 = memref.load %arg2[%c3, %c0_9] : memref<10x2xf32, #tpu.memory_space<smem>>
    %c3_10 = arith.constant 3 : index
    %c1_11 = arith.constant 1 : index
    %7 = memref.load %arg2[%c3_10, %c1_11] : memref<10x2xf32, #tpu.memory_space<smem>>
    %c4 = arith.constant 4 : index
    %c0_12 = arith.constant 0 : index
    %8 = memref.load %arg2[%c4, %c0_12] : memref<10x2xf32, #tpu.memory_space<smem>>
    %c4_13 = arith.constant 4 : index
    %c1_14 = arith.constant 1 : index
    %9 = memref.load %arg2[%c4_13, %c1_14] : memref<10x2xf32, #tpu.memory_space<smem>>
    %c5 = arith.constant 5 : index
    %c0_15 = arith.constant 0 : index
    %10 = memref.load %arg2[%c5, %c0_15] : memref<10x2xf32, #tpu.memory_space<smem>>
    %c5_16 = arith.constant 5 : index
    %c1_17 = arith.constant 1 : index
    %11 = memref.load %arg2[%c5_16, %c1_17] : memref<10x2xf32, #tpu.memory_space<smem>>
    %c6 = arith.constant 6 : index
    %c0_18 = arith.constant 0 : index
    %12 = memref.load %arg2[%c6, %c0_18] : memref<10x2xf32, #tpu.memory_space<smem>>
    %c6_19 = arith.constant 6 : index
    %c1_20 = arith.constant 1 : index
    %13 = memref.load %arg2[%c6_19, %c1_20] : memref<10x2xf32, #tpu.memory_space<smem>>
    %c7 = arith.constant 7 : index
    %c0_21 = arith.constant 0 : index
    %14 = memref.load %arg2[%c7, %c0_21] : memref<10x2xf32, #tpu.memory_space<smem>>
    %c7_22 = arith.constant 7 : index
    %c1_23 = arith.constant 1 : index
    %15 = memref.load %arg2[%c7_22, %c1_23] : memref<10x2xf32, #tpu.memory_space<smem>>
    %c8 = arith.constant 8 : index
    %c0_24 = arith.constant 0 : index
    %16 = memref.load %arg2[%c8, %c0_24] : memref<10x2xf32, #tpu.memory_space<smem>>
    %c8_25 = arith.constant 8 : index
    %c1_26 = arith.constant 1 : index
    %17 = memref.load %arg2[%c8_25, %c1_26] : memref<10x2xf32, #tpu.memory_space<smem>>
    %c9 = arith.constant 9 : index
    %c0_27 = arith.constant 0 : index
    %18 = memref.load %arg2[%c9, %c0_27] : memref<10x2xf32, #tpu.memory_space<smem>>
    %c9_28 = arith.constant 9 : index
    %c1_29 = arith.constant 1 : index
    %19 = memref.load %arg2[%c9_28, %c1_29] : memref<10x2xf32, #tpu.memory_space<smem>>
    %c0_30 = arith.constant 0 : index
    %20 = memref.load %arg3[%c0_30] : memref<10xf32, #tpu.memory_space<smem>>
    %c1_31 = arith.constant 1 : index
    %21 = memref.load %arg3[%c1_31] : memref<10xf32, #tpu.memory_space<smem>>
    %c2_32 = arith.constant 2 : index
    %22 = memref.load %arg3[%c2_32] : memref<10xf32, #tpu.memory_space<smem>>
    %c3_33 = arith.constant 3 : index
    %23 = memref.load %arg3[%c3_33] : memref<10xf32, #tpu.memory_space<smem>>
    %c4_34 = arith.constant 4 : index
    %24 = memref.load %arg3[%c4_34] : memref<10xf32, #tpu.memory_space<smem>>
    %c5_35 = arith.constant 5 : index
    %25 = memref.load %arg3[%c5_35] : memref<10xf32, #tpu.memory_space<smem>>
    %c6_36 = arith.constant 6 : index
    %26 = memref.load %arg3[%c6_36] : memref<10xf32, #tpu.memory_space<smem>>
    %c7_37 = arith.constant 7 : index
    %27 = memref.load %arg3[%c7_37] : memref<10xf32, #tpu.memory_space<smem>>
    %c8_38 = arith.constant 8 : index
    %28 = memref.load %arg3[%c8_38] : memref<10xf32, #tpu.memory_space<smem>>
    %c9_39 = arith.constant 9 : index
    %29 = memref.load %arg3[%c9_39] : memref<10xf32, #tpu.memory_space<smem>>
    %c0_40 = arith.constant 0 : index
    %c0_41 = arith.constant 0 : index
    %30 = memref.load %arg4[%c0_40, %c0_41] : memref<10x10xf32, #tpu.memory_space<smem>>
    %c0_42 = arith.constant 0 : index
    %c1_43 = arith.constant 1 : index
    %31 = memref.load %arg4[%c0_42, %c1_43] : memref<10x10xf32, #tpu.memory_space<smem>>
    %c0_44 = arith.constant 0 : index
    %c2_45 = arith.constant 2 : index
    %32 = memref.load %arg4[%c0_44, %c2_45] : memref<10x10xf32, #tpu.memory_space<smem>>
    %c0_46 = arith.constant 0 : index
    %c3_47 = arith.constant 3 : index
    %33 = memref.load %arg4[%c0_46, %c3_47] : memref<10x10xf32, #tpu.memory_space<smem>>
    %c0_48 = arith.constant 0 : index
    %c4_49 = arith.constant 4 : index
    %34 = memref.load %arg4[%c0_48, %c4_49] : memref<10x10xf32, #tpu.memory_space<smem>>
    %c0_50 = arith.constant 0 : index
    %c5_51 = arith.constant 5 : index
    %35 = memref.load %arg4[%c0_50, %c5_51] : memref<10x10xf32, #tpu.memory_space<smem>>
    %c0_52 = arith.constant 0 : index
    %c6_53 = arith.constant 6 : index
    %36 = memref.load %arg4[%c0_52, %c6_53] : memref<10x10xf32, #tpu.memory_space<smem>>
    %c0_54 = arith.constant 0 : index
    %c7_55 = arith.constant 7 : index
    %37 = memref.load %arg4[%c0_54, %c7_55] : memref<10x10xf32, #tpu.memory_space<smem>>
    %c0_56 = arith.constant 0 : index
    %c8_57 = arith.constant 8 : index
    %38 = memref.load %arg4[%c0_56, %c8_57] : memref<10x10xf32, #tpu.memory_space<smem>>
    %c0_58 = arith.constant 0 : index
    %c9_59 = arith.constant 9 : index
    %39 = memref.load %arg4[%c0_58, %c9_59] : memref<10x10xf32, #tpu.memory_space<smem>>
    %c1_60 = arith.constant 1 : index
    %c0_61 = arith.constant 0 : index
    %40 = memref.load %arg4[%c1_60, %c0_61] : memref<10x10xf32, #tpu.memory_space<smem>>
    %c1_62 = arith.constant 1 : index
    %c1_63 = arith.constant 1 : index
    %41 = memref.load %arg4[%c1_62, %c1_63] : memref<10x10xf32, #tpu.memory_space<smem>>
    %c1_64 = arith.constant 1 : index
    %c2_65 = arith.constant 2 : index
    %42 = memref.load %arg4[%c1_64, %c2_65] : memref<10x10xf32, #tpu.memory_space<smem>>
    %c1_66 = arith.constant 1 : index
    %c3_67 = arith.constant 3 : index
    %43 = memref.load %arg4[%c1_66, %c3_67] : memref<10x10xf32, #tpu.memory_space<smem>>
    %c1_68 = arith.constant 1 : index
    %c4_69 = arith.constant 4 : index
    %44 = memref.load %arg4[%c1_68, %c4_69] : memref<10x10xf32, #tpu.memory_space<smem>>
    %c1_70 = arith.constant 1 : index
    %c5_71 = arith.constant 5 : index
    %45 = memref.load %arg4[%c1_70, %c5_71] : memref<10x10xf32, #tpu.memory_space<smem>>
    %c1_72 = arith.constant 1 : index
    %c6_73 = arith.constant 6 : index
    %46 = memref.load %arg4[%c1_72, %c6_73] : memref<10x10xf32, #tpu.memory_space<smem>>
    %c1_74 = arith.constant 1 : index
    %c7_75 = arith.constant 7 : index
    %47 = memref.load %arg4[%c1_74, %c7_75] : memref<10x10xf32, #tpu.memory_space<smem>>
    %c1_76 = arith.constant 1 : index
    %c8_77 = arith.constant 8 : index
    %48 = memref.load %arg4[%c1_76, %c8_77] : memref<10x10xf32, #tpu.memory_space<smem>>
    %c1_78 = arith.constant 1 : index
    %c9_79 = arith.constant 9 : index
    %49 = memref.load %arg4[%c1_78, %c9_79] : memref<10x10xf32, #tpu.memory_space<smem>>
    %c2_80 = arith.constant 2 : index
    %c0_81 = arith.constant 0 : index
    %50 = memref.load %arg4[%c2_80, %c0_81] : memref<10x10xf32, #tpu.memory_space<smem>>
    %c2_82 = arith.constant 2 : index
    %c1_83 = arith.constant 1 : index
    %51 = memref.load %arg4[%c2_82, %c1_83] : memref<10x10xf32, #tpu.memory_space<smem>>
    %c2_84 = arith.constant 2 : index
    %c2_85 = arith.constant 2 : index
    %52 = memref.load %arg4[%c2_84, %c2_85] : memref<10x10xf32, #tpu.memory_space<smem>>
    %c2_86 = arith.constant 2 : index
    %c3_87 = arith.constant 3 : index
    %53 = memref.load %arg4[%c2_86, %c3_87] : memref<10x10xf32, #tpu.memory_space<smem>>
    %c2_88 = arith.constant 2 : index
    %c4_89 = arith.constant 4 : index
    %54 = memref.load %arg4[%c2_88, %c4_89] : memref<10x10xf32, #tpu.memory_space<smem>>
    %c2_90 = arith.constant 2 : index
    %c5_91 = arith.constant 5 : index
    %55 = memref.load %arg4[%c2_90, %c5_91] : memref<10x10xf32, #tpu.memory_space<smem>>
    %c2_92 = arith.constant 2 : index
    %c6_93 = arith.constant 6 : index
    %56 = memref.load %arg4[%c2_92, %c6_93] : memref<10x10xf32, #tpu.memory_space<smem>>
    %c2_94 = arith.constant 2 : index
    %c7_95 = arith.constant 7 : index
    %57 = memref.load %arg4[%c2_94, %c7_95] : memref<10x10xf32, #tpu.memory_space<smem>>
    %c2_96 = arith.constant 2 : index
    %c8_97 = arith.constant 8 : index
    %58 = memref.load %arg4[%c2_96, %c8_97] : memref<10x10xf32, #tpu.memory_space<smem>>
    %c2_98 = arith.constant 2 : index
    %c9_99 = arith.constant 9 : index
    %59 = memref.load %arg4[%c2_98, %c9_99] : memref<10x10xf32, #tpu.memory_space<smem>>
    %c3_100 = arith.constant 3 : index
    %c0_101 = arith.constant 0 : index
    %60 = memref.load %arg4[%c3_100, %c0_101] : memref<10x10xf32, #tpu.memory_space<smem>>
    %c3_102 = arith.constant 3 : index
    %c1_103 = arith.constant 1 : index
    %61 = memref.load %arg4[%c3_102, %c1_103] : memref<10x10xf32, #tpu.memory_space<smem>>
    %c3_104 = arith.constant 3 : index
    %c2_105 = arith.constant 2 : index
    %62 = memref.load %arg4[%c3_104, %c2_105] : memref<10x10xf32, #tpu.memory_space<smem>>
    %c3_106 = arith.constant 3 : index
    %c3_107 = arith.constant 3 : index
    %63 = memref.load %arg4[%c3_106, %c3_107] : memref<10x10xf32, #tpu.memory_space<smem>>
    %c3_108 = arith.constant 3 : index
    %c4_109 = arith.constant 4 : index
    %64 = memref.load %arg4[%c3_108, %c4_109] : memref<10x10xf32, #tpu.memory_space<smem>>
    %c3_110 = arith.constant 3 : index
    %c5_111 = arith.constant 5 : index
    %65 = memref.load %arg4[%c3_110, %c5_111] : memref<10x10xf32, #tpu.memory_space<smem>>
    %c3_112 = arith.constant 3 : index
    %c6_113 = arith.constant 6 : index
    %66 = memref.load %arg4[%c3_112, %c6_113] : memref<10x10xf32, #tpu.memory_space<smem>>
    %c3_114 = arith.constant 3 : index
    %c7_115 = arith.constant 7 : index
    %67 = memref.load %arg4[%c3_114, %c7_115] : memref<10x10xf32, #tpu.memory_space<smem>>
    %c3_116 = arith.constant 3 : index
    %c8_117 = arith.constant 8 : index
    %68 = memref.load %arg4[%c3_116, %c8_117] : memref<10x10xf32, #tpu.memory_space<smem>>
    %c3_118 = arith.constant 3 : index
    %c9_119 = arith.constant 9 : index
    %69 = memref.load %arg4[%c3_118, %c9_119] : memref<10x10xf32, #tpu.memory_space<smem>>
    %c4_120 = arith.constant 4 : index
    %c0_121 = arith.constant 0 : index
    %70 = memref.load %arg4[%c4_120, %c0_121] : memref<10x10xf32, #tpu.memory_space<smem>>
    %c4_122 = arith.constant 4 : index
    %c1_123 = arith.constant 1 : index
    %71 = memref.load %arg4[%c4_122, %c1_123] : memref<10x10xf32, #tpu.memory_space<smem>>
    %c4_124 = arith.constant 4 : index
    %c2_125 = arith.constant 2 : index
    %72 = memref.load %arg4[%c4_124, %c2_125] : memref<10x10xf32, #tpu.memory_space<smem>>
    %c4_126 = arith.constant 4 : index
    %c3_127 = arith.constant 3 : index
    %73 = memref.load %arg4[%c4_126, %c3_127] : memref<10x10xf32, #tpu.memory_space<smem>>
    %c4_128 = arith.constant 4 : index
    %c4_129 = arith.constant 4 : index
    %74 = memref.load %arg4[%c4_128, %c4_129] : memref<10x10xf32, #tpu.memory_space<smem>>
    %c4_130 = arith.constant 4 : index
    %c5_131 = arith.constant 5 : index
    %75 = memref.load %arg4[%c4_130, %c5_131] : memref<10x10xf32, #tpu.memory_space<smem>>
    %c4_132 = arith.constant 4 : index
    %c6_133 = arith.constant 6 : index
    %76 = memref.load %arg4[%c4_132, %c6_133] : memref<10x10xf32, #tpu.memory_space<smem>>
    %c4_134 = arith.constant 4 : index
    %c7_135 = arith.constant 7 : index
    %77 = memref.load %arg4[%c4_134, %c7_135] : memref<10x10xf32, #tpu.memory_space<smem>>
    %c4_136 = arith.constant 4 : index
    %c8_137 = arith.constant 8 : index
    %78 = memref.load %arg4[%c4_136, %c8_137] : memref<10x10xf32, #tpu.memory_space<smem>>
    %c4_138 = arith.constant 4 : index
    %c9_139 = arith.constant 9 : index
    %79 = memref.load %arg4[%c4_138, %c9_139] : memref<10x10xf32, #tpu.memory_space<smem>>
    %c5_140 = arith.constant 5 : index
    %c0_141 = arith.constant 0 : index
    %80 = memref.load %arg4[%c5_140, %c0_141] : memref<10x10xf32, #tpu.memory_space<smem>>
    %c5_142 = arith.constant 5 : index
    %c1_143 = arith.constant 1 : index
    %81 = memref.load %arg4[%c5_142, %c1_143] : memref<10x10xf32, #tpu.memory_space<smem>>
    %c5_144 = arith.constant 5 : index
    %c2_145 = arith.constant 2 : index
    %82 = memref.load %arg4[%c5_144, %c2_145] : memref<10x10xf32, #tpu.memory_space<smem>>
    %c5_146 = arith.constant 5 : index
    %c3_147 = arith.constant 3 : index
    %83 = memref.load %arg4[%c5_146, %c3_147] : memref<10x10xf32, #tpu.memory_space<smem>>
    %c5_148 = arith.constant 5 : index
    %c4_149 = arith.constant 4 : index
    %84 = memref.load %arg4[%c5_148, %c4_149] : memref<10x10xf32, #tpu.memory_space<smem>>
    %c5_150 = arith.constant 5 : index
    %c5_151 = arith.constant 5 : index
    %85 = memref.load %arg4[%c5_150, %c5_151] : memref<10x10xf32, #tpu.memory_space<smem>>
    %c5_152 = arith.constant 5 : index
    %c6_153 = arith.constant 6 : index
    %86 = memref.load %arg4[%c5_152, %c6_153] : memref<10x10xf32, #tpu.memory_space<smem>>
    %c5_154 = arith.constant 5 : index
    %c7_155 = arith.constant 7 : index
    %87 = memref.load %arg4[%c5_154, %c7_155] : memref<10x10xf32, #tpu.memory_space<smem>>
    %c5_156 = arith.constant 5 : index
    %c8_157 = arith.constant 8 : index
    %88 = memref.load %arg4[%c5_156, %c8_157] : memref<10x10xf32, #tpu.memory_space<smem>>
    %c5_158 = arith.constant 5 : index
    %c9_159 = arith.constant 9 : index
    %89 = memref.load %arg4[%c5_158, %c9_159] : memref<10x10xf32, #tpu.memory_space<smem>>
    %c6_160 = arith.constant 6 : index
    %c0_161 = arith.constant 0 : index
    %90 = memref.load %arg4[%c6_160, %c0_161] : memref<10x10xf32, #tpu.memory_space<smem>>
    %c6_162 = arith.constant 6 : index
    %c1_163 = arith.constant 1 : index
    %91 = memref.load %arg4[%c6_162, %c1_163] : memref<10x10xf32, #tpu.memory_space<smem>>
    %c6_164 = arith.constant 6 : index
    %c2_165 = arith.constant 2 : index
    %92 = memref.load %arg4[%c6_164, %c2_165] : memref<10x10xf32, #tpu.memory_space<smem>>
    %c6_166 = arith.constant 6 : index
    %c3_167 = arith.constant 3 : index
    %93 = memref.load %arg4[%c6_166, %c3_167] : memref<10x10xf32, #tpu.memory_space<smem>>
    %c6_168 = arith.constant 6 : index
    %c4_169 = arith.constant 4 : index
    %94 = memref.load %arg4[%c6_168, %c4_169] : memref<10x10xf32, #tpu.memory_space<smem>>
    %c6_170 = arith.constant 6 : index
    %c5_171 = arith.constant 5 : index
    %95 = memref.load %arg4[%c6_170, %c5_171] : memref<10x10xf32, #tpu.memory_space<smem>>
    %c6_172 = arith.constant 6 : index
    %c6_173 = arith.constant 6 : index
    %96 = memref.load %arg4[%c6_172, %c6_173] : memref<10x10xf32, #tpu.memory_space<smem>>
    %c6_174 = arith.constant 6 : index
    %c7_175 = arith.constant 7 : index
    %97 = memref.load %arg4[%c6_174, %c7_175] : memref<10x10xf32, #tpu.memory_space<smem>>
    %c6_176 = arith.constant 6 : index
    %c8_177 = arith.constant 8 : index
    %98 = memref.load %arg4[%c6_176, %c8_177] : memref<10x10xf32, #tpu.memory_space<smem>>
    %c6_178 = arith.constant 6 : index
    %c9_179 = arith.constant 9 : index
    %99 = memref.load %arg4[%c6_178, %c9_179] : memref<10x10xf32, #tpu.memory_space<smem>>
    %c7_180 = arith.constant 7 : index
    %c0_181 = arith.constant 0 : index
    %100 = memref.load %arg4[%c7_180, %c0_181] : memref<10x10xf32, #tpu.memory_space<smem>>
    %c7_182 = arith.constant 7 : index
    %c1_183 = arith.constant 1 : index
    %101 = memref.load %arg4[%c7_182, %c1_183] : memref<10x10xf32, #tpu.memory_space<smem>>
    %c7_184 = arith.constant 7 : index
    %c2_185 = arith.constant 2 : index
    %102 = memref.load %arg4[%c7_184, %c2_185] : memref<10x10xf32, #tpu.memory_space<smem>>
    %c7_186 = arith.constant 7 : index
    %c3_187 = arith.constant 3 : index
    %103 = memref.load %arg4[%c7_186, %c3_187] : memref<10x10xf32, #tpu.memory_space<smem>>
    %c7_188 = arith.constant 7 : index
    %c4_189 = arith.constant 4 : index
    %104 = memref.load %arg4[%c7_188, %c4_189] : memref<10x10xf32, #tpu.memory_space<smem>>
    %c7_190 = arith.constant 7 : index
    %c5_191 = arith.constant 5 : index
    %105 = memref.load %arg4[%c7_190, %c5_191] : memref<10x10xf32, #tpu.memory_space<smem>>
    %c7_192 = arith.constant 7 : index
    %c6_193 = arith.constant 6 : index
    %106 = memref.load %arg4[%c7_192, %c6_193] : memref<10x10xf32, #tpu.memory_space<smem>>
    %c7_194 = arith.constant 7 : index
    %c7_195 = arith.constant 7 : index
    %107 = memref.load %arg4[%c7_194, %c7_195] : memref<10x10xf32, #tpu.memory_space<smem>>
    %c7_196 = arith.constant 7 : index
    %c8_197 = arith.constant 8 : index
    %108 = memref.load %arg4[%c7_196, %c8_197] : memref<10x10xf32, #tpu.memory_space<smem>>
    %c7_198 = arith.constant 7 : index
    %c9_199 = arith.constant 9 : index
    %109 = memref.load %arg4[%c7_198, %c9_199] : memref<10x10xf32, #tpu.memory_space<smem>>
    %c8_200 = arith.constant 8 : index
    %c0_201 = arith.constant 0 : index
    %110 = memref.load %arg4[%c8_200, %c0_201] : memref<10x10xf32, #tpu.memory_space<smem>>
    %c8_202 = arith.constant 8 : index
    %c1_203 = arith.constant 1 : index
    %111 = memref.load %arg4[%c8_202, %c1_203] : memref<10x10xf32, #tpu.memory_space<smem>>
    %c8_204 = arith.constant 8 : index
    %c2_205 = arith.constant 2 : index
    %112 = memref.load %arg4[%c8_204, %c2_205] : memref<10x10xf32, #tpu.memory_space<smem>>
    %c8_206 = arith.constant 8 : index
    %c3_207 = arith.constant 3 : index
    %113 = memref.load %arg4[%c8_206, %c3_207] : memref<10x10xf32, #tpu.memory_space<smem>>
    %c8_208 = arith.constant 8 : index
    %c4_209 = arith.constant 4 : index
    %114 = memref.load %arg4[%c8_208, %c4_209] : memref<10x10xf32, #tpu.memory_space<smem>>
    %c8_210 = arith.constant 8 : index
    %c5_211 = arith.constant 5 : index
    %115 = memref.load %arg4[%c8_210, %c5_211] : memref<10x10xf32, #tpu.memory_space<smem>>
    %c8_212 = arith.constant 8 : index
    %c6_213 = arith.constant 6 : index
    %116 = memref.load %arg4[%c8_212, %c6_213] : memref<10x10xf32, #tpu.memory_space<smem>>
    %c8_214 = arith.constant 8 : index
    %c7_215 = arith.constant 7 : index
    %117 = memref.load %arg4[%c8_214, %c7_215] : memref<10x10xf32, #tpu.memory_space<smem>>
    %c8_216 = arith.constant 8 : index
    %c8_217 = arith.constant 8 : index
    %118 = memref.load %arg4[%c8_216, %c8_217] : memref<10x10xf32, #tpu.memory_space<smem>>
    %c8_218 = arith.constant 8 : index
    %c9_219 = arith.constant 9 : index
    %119 = memref.load %arg4[%c8_218, %c9_219] : memref<10x10xf32, #tpu.memory_space<smem>>
    %c9_220 = arith.constant 9 : index
    %c0_221 = arith.constant 0 : index
    %120 = memref.load %arg4[%c9_220, %c0_221] : memref<10x10xf32, #tpu.memory_space<smem>>
    %c9_222 = arith.constant 9 : index
    %c1_223 = arith.constant 1 : index
    %121 = memref.load %arg4[%c9_222, %c1_223] : memref<10x10xf32, #tpu.memory_space<smem>>
    %c9_224 = arith.constant 9 : index
    %c2_225 = arith.constant 2 : index
    %122 = memref.load %arg4[%c9_224, %c2_225] : memref<10x10xf32, #tpu.memory_space<smem>>
    %c9_226 = arith.constant 9 : index
    %c3_227 = arith.constant 3 : index
    %123 = memref.load %arg4[%c9_226, %c3_227] : memref<10x10xf32, #tpu.memory_space<smem>>
    %c9_228 = arith.constant 9 : index
    %c4_229 = arith.constant 4 : index
    %124 = memref.load %arg4[%c9_228, %c4_229] : memref<10x10xf32, #tpu.memory_space<smem>>
    %c9_230 = arith.constant 9 : index
    %c5_231 = arith.constant 5 : index
    %125 = memref.load %arg4[%c9_230, %c5_231] : memref<10x10xf32, #tpu.memory_space<smem>>
    %c9_232 = arith.constant 9 : index
    %c6_233 = arith.constant 6 : index
    %126 = memref.load %arg4[%c9_232, %c6_233] : memref<10x10xf32, #tpu.memory_space<smem>>
    %c9_234 = arith.constant 9 : index
    %c7_235 = arith.constant 7 : index
    %127 = memref.load %arg4[%c9_234, %c7_235] : memref<10x10xf32, #tpu.memory_space<smem>>
    %c9_236 = arith.constant 9 : index
    %c8_237 = arith.constant 8 : index
    %128 = memref.load %arg4[%c9_236, %c8_237] : memref<10x10xf32, #tpu.memory_space<smem>>
    %c9_238 = arith.constant 9 : index
    %c9_239 = arith.constant 9 : index
    %129 = memref.load %arg4[%c9_238, %c9_239] : memref<10x10xf32, #tpu.memory_space<smem>>
    %c0_240 = arith.constant 0 : index
    %130 = memref.load %arg5[%c0_240] : memref<10xf32, #tpu.memory_space<smem>>
    %c1_241 = arith.constant 1 : index
    %131 = memref.load %arg5[%c1_241] : memref<10xf32, #tpu.memory_space<smem>>
    %c2_242 = arith.constant 2 : index
    %132 = memref.load %arg5[%c2_242] : memref<10xf32, #tpu.memory_space<smem>>
    %c3_243 = arith.constant 3 : index
    %133 = memref.load %arg5[%c3_243] : memref<10xf32, #tpu.memory_space<smem>>
    %c4_244 = arith.constant 4 : index
    %134 = memref.load %arg5[%c4_244] : memref<10xf32, #tpu.memory_space<smem>>
    %c5_245 = arith.constant 5 : index
    %135 = memref.load %arg5[%c5_245] : memref<10xf32, #tpu.memory_space<smem>>
    %c6_246 = arith.constant 6 : index
    %136 = memref.load %arg5[%c6_246] : memref<10xf32, #tpu.memory_space<smem>>
    %c7_247 = arith.constant 7 : index
    %137 = memref.load %arg5[%c7_247] : memref<10xf32, #tpu.memory_space<smem>>
    %c8_248 = arith.constant 8 : index
    %138 = memref.load %arg5[%c8_248] : memref<10xf32, #tpu.memory_space<smem>>
    %c9_249 = arith.constant 9 : index
    %139 = memref.load %arg5[%c9_249] : memref<10xf32, #tpu.memory_space<smem>>
    %c0_250 = arith.constant 0 : index
    %c0_251 = arith.constant 0 : index
    %140 = memref.load %arg6[%c0_250, %c0_251] : memref<2x10xf32, #tpu.memory_space<smem>>
    %c0_252 = arith.constant 0 : index
    %c1_253 = arith.constant 1 : index
    %141 = memref.load %arg6[%c0_252, %c1_253] : memref<2x10xf32, #tpu.memory_space<smem>>
    %c0_254 = arith.constant 0 : index
    %c2_255 = arith.constant 2 : index
    %142 = memref.load %arg6[%c0_254, %c2_255] : memref<2x10xf32, #tpu.memory_space<smem>>
    %c0_256 = arith.constant 0 : index
    %c3_257 = arith.constant 3 : index
    %143 = memref.load %arg6[%c0_256, %c3_257] : memref<2x10xf32, #tpu.memory_space<smem>>
    %c0_258 = arith.constant 0 : index
    %c4_259 = arith.constant 4 : index
    %144 = memref.load %arg6[%c0_258, %c4_259] : memref<2x10xf32, #tpu.memory_space<smem>>
    %c0_260 = arith.constant 0 : index
    %c5_261 = arith.constant 5 : index
    %145 = memref.load %arg6[%c0_260, %c5_261] : memref<2x10xf32, #tpu.memory_space<smem>>
    %c0_262 = arith.constant 0 : index
    %c6_263 = arith.constant 6 : index
    %146 = memref.load %arg6[%c0_262, %c6_263] : memref<2x10xf32, #tpu.memory_space<smem>>
    %c0_264 = arith.constant 0 : index
    %c7_265 = arith.constant 7 : index
    %147 = memref.load %arg6[%c0_264, %c7_265] : memref<2x10xf32, #tpu.memory_space<smem>>
    %c0_266 = arith.constant 0 : index
    %c8_267 = arith.constant 8 : index
    %148 = memref.load %arg6[%c0_266, %c8_267] : memref<2x10xf32, #tpu.memory_space<smem>>
    %c0_268 = arith.constant 0 : index
    %c9_269 = arith.constant 9 : index
    %149 = memref.load %arg6[%c0_268, %c9_269] : memref<2x10xf32, #tpu.memory_space<smem>>
    %c1_270 = arith.constant 1 : index
    %c0_271 = arith.constant 0 : index
    %150 = memref.load %arg6[%c1_270, %c0_271] : memref<2x10xf32, #tpu.memory_space<smem>>
    %c1_272 = arith.constant 1 : index
    %c1_273 = arith.constant 1 : index
    %151 = memref.load %arg6[%c1_272, %c1_273] : memref<2x10xf32, #tpu.memory_space<smem>>
    %c1_274 = arith.constant 1 : index
    %c2_275 = arith.constant 2 : index
    %152 = memref.load %arg6[%c1_274, %c2_275] : memref<2x10xf32, #tpu.memory_space<smem>>
    %c1_276 = arith.constant 1 : index
    %c3_277 = arith.constant 3 : index
    %153 = memref.load %arg6[%c1_276, %c3_277] : memref<2x10xf32, #tpu.memory_space<smem>>
    %c1_278 = arith.constant 1 : index
    %c4_279 = arith.constant 4 : index
    %154 = memref.load %arg6[%c1_278, %c4_279] : memref<2x10xf32, #tpu.memory_space<smem>>
    %c1_280 = arith.constant 1 : index
    %c5_281 = arith.constant 5 : index
    %155 = memref.load %arg6[%c1_280, %c5_281] : memref<2x10xf32, #tpu.memory_space<smem>>
    %c1_282 = arith.constant 1 : index
    %c6_283 = arith.constant 6 : index
    %156 = memref.load %arg6[%c1_282, %c6_283] : memref<2x10xf32, #tpu.memory_space<smem>>
    %c1_284 = arith.constant 1 : index
    %c7_285 = arith.constant 7 : index
    %157 = memref.load %arg6[%c1_284, %c7_285] : memref<2x10xf32, #tpu.memory_space<smem>>
    %c1_286 = arith.constant 1 : index
    %c8_287 = arith.constant 8 : index
    %158 = memref.load %arg6[%c1_286, %c8_287] : memref<2x10xf32, #tpu.memory_space<smem>>
    %c1_288 = arith.constant 1 : index
    %c9_289 = arith.constant 9 : index
    %159 = memref.load %arg6[%c1_288, %c9_289] : memref<2x10xf32, #tpu.memory_space<smem>>
    %c0_290 = arith.constant 0 : index
    %160 = memref.load %arg7[%c0_290] : memref<2xf32, #tpu.memory_space<smem>>
    %c1_291 = arith.constant 1 : index
    %161 = memref.load %arg7[%c1_291] : memref<2xf32, #tpu.memory_space<smem>>
    %c0_i32 = arith.constant 0 : i32
    %c2_i32 = arith.constant 2 : i32
    %162 = arith.addi %c0_i32, %c2_i32 : i32
    %c1_i32 = arith.constant 1 : i32
    scf.for %arg9 = %c0_i32 to %162 step %c1_i32  : i32 {
      %c8_i32 = arith.constant 8 : i32
      %163 = arith.muli %arg9, %c8_i32 : i32
      %164 = tpu.assume_multiple %163, 8 : i32
      %c0_293 = arith.constant 0 : index
      %165 = arith.index_cast %164 : i32 to index
      %c0_294 = arith.constant 0 : index
      %166 = vector.load %arg1[%c0_293, %165, %c0_294] : memref<2x16x128xf32, #tpu.memory_space<vmem>>, vector<1x8x128xf32>
      %167 = vector.shape_cast %166 : vector<1x8x128xf32> to vector<8x128xf32>
      %c1_295 = arith.constant 1 : index
      %168 = arith.index_cast %164 : i32 to index
      %c0_296 = arith.constant 0 : index
      %169 = vector.load %arg1[%c1_295, %168, %c0_296] : memref<2x16x128xf32, #tpu.memory_space<vmem>>, vector<1x8x128xf32>
      %170 = vector.shape_cast %169 : vector<1x8x128xf32> to vector<8x128xf32>
      %171 = vector.broadcast %0 : f32 to vector<8x128xf32>
      %172 = arith.mulf %171, %167 : vector<8x128xf32>
      %173 = vector.broadcast %1 : f32 to vector<8x128xf32>
      %174 = arith.mulf %173, %170 : vector<8x128xf32>
      %175 = arith.addf %172, %174 : vector<8x128xf32>
      %176 = vector.broadcast %20 : f32 to vector<8x128xf32>
      %177 = arith.addf %175, %176 : vector<8x128xf32>
      %cst = arith.constant 0.000000e+00 : f32
      %178 = vector.broadcast %cst : f32 to vector<8x128xf32>
      %179 = arith.maximumf %177, %178 : vector<8x128xf32>
      %180 = vector.broadcast %2 : f32 to vector<8x128xf32>
      %181 = arith.mulf %180, %167 : vector<8x128xf32>
      %182 = vector.broadcast %3 : f32 to vector<8x128xf32>
      %183 = arith.mulf %182, %170 : vector<8x128xf32>
      %184 = arith.addf %181, %183 : vector<8x128xf32>
      %185 = vector.broadcast %21 : f32 to vector<8x128xf32>
      %186 = arith.addf %184, %185 : vector<8x128xf32>
      %cst_297 = arith.constant 0.000000e+00 : f32
      %187 = vector.broadcast %cst_297 : f32 to vector<8x128xf32>
      %188 = arith.maximumf %186, %187 : vector<8x128xf32>
      %189 = vector.broadcast %4 : f32 to vector<8x128xf32>
      %190 = arith.mulf %189, %167 : vector<8x128xf32>
      %191 = vector.broadcast %5 : f32 to vector<8x128xf32>
      %192 = arith.mulf %191, %170 : vector<8x128xf32>
      %193 = arith.addf %190, %192 : vector<8x128xf32>
      %194 = vector.broadcast %22 : f32 to vector<8x128xf32>
      %195 = arith.addf %193, %194 : vector<8x128xf32>
      %cst_298 = arith.constant 0.000000e+00 : f32
      %196 = vector.broadcast %cst_298 : f32 to vector<8x128xf32>
      %197 = arith.maximumf %195, %196 : vector<8x128xf32>
      %198 = vector.broadcast %6 : f32 to vector<8x128xf32>
      %199 = arith.mulf %198, %167 : vector<8x128xf32>
      %200 = vector.broadcast %7 : f32 to vector<8x128xf32>
      %201 = arith.mulf %200, %170 : vector<8x128xf32>
      %202 = arith.addf %199, %201 : vector<8x128xf32>
      %203 = vector.broadcast %23 : f32 to vector<8x128xf32>
      %204 = arith.addf %202, %203 : vector<8x128xf32>
      %cst_299 = arith.constant 0.000000e+00 : f32
      %205 = vector.broadcast %cst_299 : f32 to vector<8x128xf32>
      %206 = arith.maximumf %204, %205 : vector<8x128xf32>
      %207 = vector.broadcast %8 : f32 to vector<8x128xf32>
      %208 = arith.mulf %207, %167 : vector<8x128xf32>
      %209 = vector.broadcast %9 : f32 to vector<8x128xf32>
      %210 = arith.mulf %209, %170 : vector<8x128xf32>
      %211 = arith.addf %208, %210 : vector<8x128xf32>
      %212 = vector.broadcast %24 : f32 to vector<8x128xf32>
      %213 = arith.addf %211, %212 : vector<8x128xf32>
      %cst_300 = arith.constant 0.000000e+00 : f32
      %214 = vector.broadcast %cst_300 : f32 to vector<8x128xf32>
      %215 = arith.maximumf %213, %214 : vector<8x128xf32>
      %216 = vector.broadcast %10 : f32 to vector<8x128xf32>
      %217 = arith.mulf %216, %167 : vector<8x128xf32>
      %218 = vector.broadcast %11 : f32 to vector<8x128xf32>
      %219 = arith.mulf %218, %170 : vector<8x128xf32>
      %220 = arith.addf %217, %219 : vector<8x128xf32>
      %221 = vector.broadcast %25 : f32 to vector<8x128xf32>
      %222 = arith.addf %220, %221 : vector<8x128xf32>
      %cst_301 = arith.constant 0.000000e+00 : f32
      %223 = vector.broadcast %cst_301 : f32 to vector<8x128xf32>
      %224 = arith.maximumf %222, %223 : vector<8x128xf32>
      %225 = vector.broadcast %12 : f32 to vector<8x128xf32>
      %226 = arith.mulf %225, %167 : vector<8x128xf32>
      %227 = vector.broadcast %13 : f32 to vector<8x128xf32>
      %228 = arith.mulf %227, %170 : vector<8x128xf32>
      %229 = arith.addf %226, %228 : vector<8x128xf32>
      %230 = vector.broadcast %26 : f32 to vector<8x128xf32>
      %231 = arith.addf %229, %230 : vector<8x128xf32>
      %cst_302 = arith.constant 0.000000e+00 : f32
      %232 = vector.broadcast %cst_302 : f32 to vector<8x128xf32>
      %233 = arith.maximumf %231, %232 : vector<8x128xf32>
      %234 = vector.broadcast %14 : f32 to vector<8x128xf32>
      %235 = arith.mulf %234, %167 : vector<8x128xf32>
      %236 = vector.broadcast %15 : f32 to vector<8x128xf32>
      %237 = arith.mulf %236, %170 : vector<8x128xf32>
      %238 = arith.addf %235, %237 : vector<8x128xf32>
      %239 = vector.broadcast %27 : f32 to vector<8x128xf32>
      %240 = arith.addf %238, %239 : vector<8x128xf32>
      %cst_303 = arith.constant 0.000000e+00 : f32
      %241 = vector.broadcast %cst_303 : f32 to vector<8x128xf32>
      %242 = arith.maximumf %240, %241 : vector<8x128xf32>
      %243 = vector.broadcast %16 : f32 to vector<8x128xf32>
      %244 = arith.mulf %243, %167 : vector<8x128xf32>
      %245 = vector.broadcast %17 : f32 to vector<8x128xf32>
      %246 = arith.mulf %245, %170 : vector<8x128xf32>
      %247 = arith.addf %244, %246 : vector<8x128xf32>
      %248 = vector.broadcast %28 : f32 to vector<8x128xf32>
      %249 = arith.addf %247, %248 : vector<8x128xf32>
      %cst_304 = arith.constant 0.000000e+00 : f32
      %250 = vector.broadcast %cst_304 : f32 to vector<8x128xf32>
      %251 = arith.maximumf %249, %250 : vector<8x128xf32>
      %252 = vector.broadcast %18 : f32 to vector<8x128xf32>
      %253 = arith.mulf %252, %167 : vector<8x128xf32>
      %254 = vector.broadcast %19 : f32 to vector<8x128xf32>
      %255 = arith.mulf %254, %170 : vector<8x128xf32>
      %256 = arith.addf %253, %255 : vector<8x128xf32>
      %257 = vector.broadcast %29 : f32 to vector<8x128xf32>
      %258 = arith.addf %256, %257 : vector<8x128xf32>
      %cst_305 = arith.constant 0.000000e+00 : f32
      %259 = vector.broadcast %cst_305 : f32 to vector<8x128xf32>
      %260 = arith.maximumf %258, %259 : vector<8x128xf32>
      %261 = vector.broadcast %30 : f32 to vector<8x128xf32>
      %262 = arith.mulf %261, %179 : vector<8x128xf32>
      %263 = vector.broadcast %31 : f32 to vector<8x128xf32>
      %264 = arith.mulf %263, %188 : vector<8x128xf32>
      %265 = arith.addf %262, %264 : vector<8x128xf32>
      %266 = vector.broadcast %32 : f32 to vector<8x128xf32>
      %267 = arith.mulf %266, %197 : vector<8x128xf32>
      %268 = arith.addf %265, %267 : vector<8x128xf32>
      %269 = vector.broadcast %33 : f32 to vector<8x128xf32>
      %270 = arith.mulf %269, %206 : vector<8x128xf32>
      %271 = arith.addf %268, %270 : vector<8x128xf32>
      %272 = vector.broadcast %34 : f32 to vector<8x128xf32>
      %273 = arith.mulf %272, %215 : vector<8x128xf32>
      %274 = arith.addf %271, %273 : vector<8x128xf32>
      %275 = vector.broadcast %35 : f32 to vector<8x128xf32>
      %276 = arith.mulf %275, %224 : vector<8x128xf32>
      %277 = arith.addf %274, %276 : vector<8x128xf32>
      %278 = vector.broadcast %36 : f32 to vector<8x128xf32>
      %279 = arith.mulf %278, %233 : vector<8x128xf32>
      %280 = arith.addf %277, %279 : vector<8x128xf32>
      %281 = vector.broadcast %37 : f32 to vector<8x128xf32>
      %282 = arith.mulf %281, %242 : vector<8x128xf32>
      %283 = arith.addf %280, %282 : vector<8x128xf32>
      %284 = vector.broadcast %38 : f32 to vector<8x128xf32>
      %285 = arith.mulf %284, %251 : vector<8x128xf32>
      %286 = arith.addf %283, %285 : vector<8x128xf32>
      %287 = vector.broadcast %39 : f32 to vector<8x128xf32>
      %288 = arith.mulf %287, %260 : vector<8x128xf32>
      %289 = arith.addf %286, %288 : vector<8x128xf32>
      %290 = vector.broadcast %130 : f32 to vector<8x128xf32>
      %291 = arith.addf %289, %290 : vector<8x128xf32>
      %cst_306 = arith.constant 0.000000e+00 : f32
      %292 = vector.broadcast %cst_306 : f32 to vector<8x128xf32>
      %293 = arith.maximumf %291, %292 : vector<8x128xf32>
      %294 = vector.broadcast %40 : f32 to vector<8x128xf32>
      %295 = arith.mulf %294, %179 : vector<8x128xf32>
      %296 = vector.broadcast %41 : f32 to vector<8x128xf32>
      %297 = arith.mulf %296, %188 : vector<8x128xf32>
      %298 = arith.addf %295, %297 : vector<8x128xf32>
      %299 = vector.broadcast %42 : f32 to vector<8x128xf32>
      %300 = arith.mulf %299, %197 : vector<8x128xf32>
      %301 = arith.addf %298, %300 : vector<8x128xf32>
      %302 = vector.broadcast %43 : f32 to vector<8x128xf32>
      %303 = arith.mulf %302, %206 : vector<8x128xf32>
      %304 = arith.addf %301, %303 : vector<8x128xf32>
      %305 = vector.broadcast %44 : f32 to vector<8x128xf32>
      %306 = arith.mulf %305, %215 : vector<8x128xf32>
      %307 = arith.addf %304, %306 : vector<8x128xf32>
      %308 = vector.broadcast %45 : f32 to vector<8x128xf32>
      %309 = arith.mulf %308, %224 : vector<8x128xf32>
      %310 = arith.addf %307, %309 : vector<8x128xf32>
      %311 = vector.broadcast %46 : f32 to vector<8x128xf32>
      %312 = arith.mulf %311, %233 : vector<8x128xf32>
      %313 = arith.addf %310, %312 : vector<8x128xf32>
      %314 = vector.broadcast %47 : f32 to vector<8x128xf32>
      %315 = arith.mulf %314, %242 : vector<8x128xf32>
      %316 = arith.addf %313, %315 : vector<8x128xf32>
      %317 = vector.broadcast %48 : f32 to vector<8x128xf32>
      %318 = arith.mulf %317, %251 : vector<8x128xf32>
      %319 = arith.addf %316, %318 : vector<8x128xf32>
      %320 = vector.broadcast %49 : f32 to vector<8x128xf32>
      %321 = arith.mulf %320, %260 : vector<8x128xf32>
      %322 = arith.addf %319, %321 : vector<8x128xf32>
      %323 = vector.broadcast %131 : f32 to vector<8x128xf32>
      %324 = arith.addf %322, %323 : vector<8x128xf32>
      %cst_307 = arith.constant 0.000000e+00 : f32
      %325 = vector.broadcast %cst_307 : f32 to vector<8x128xf32>
      %326 = arith.maximumf %324, %325 : vector<8x128xf32>
      %327 = vector.broadcast %50 : f32 to vector<8x128xf32>
      %328 = arith.mulf %327, %179 : vector<8x128xf32>
      %329 = vector.broadcast %51 : f32 to vector<8x128xf32>
      %330 = arith.mulf %329, %188 : vector<8x128xf32>
      %331 = arith.addf %328, %330 : vector<8x128xf32>
      %332 = vector.broadcast %52 : f32 to vector<8x128xf32>
      %333 = arith.mulf %332, %197 : vector<8x128xf32>
      %334 = arith.addf %331, %333 : vector<8x128xf32>
      %335 = vector.broadcast %53 : f32 to vector<8x128xf32>
      %336 = arith.mulf %335, %206 : vector<8x128xf32>
      %337 = arith.addf %334, %336 : vector<8x128xf32>
      %338 = vector.broadcast %54 : f32 to vector<8x128xf32>
      %339 = arith.mulf %338, %215 : vector<8x128xf32>
      %340 = arith.addf %337, %339 : vector<8x128xf32>
      %341 = vector.broadcast %55 : f32 to vector<8x128xf32>
      %342 = arith.mulf %341, %224 : vector<8x128xf32>
      %343 = arith.addf %340, %342 : vector<8x128xf32>
      %344 = vector.broadcast %56 : f32 to vector<8x128xf32>
      %345 = arith.mulf %344, %233 : vector<8x128xf32>
      %346 = arith.addf %343, %345 : vector<8x128xf32>
      %347 = vector.broadcast %57 : f32 to vector<8x128xf32>
      %348 = arith.mulf %347, %242 : vector<8x128xf32>
      %349 = arith.addf %346, %348 : vector<8x128xf32>
      %350 = vector.broadcast %58 : f32 to vector<8x128xf32>
      %351 = arith.mulf %350, %251 : vector<8x128xf32>
      %352 = arith.addf %349, %351 : vector<8x128xf32>
      %353 = vector.broadcast %59 : f32 to vector<8x128xf32>
      %354 = arith.mulf %353, %260 : vector<8x128xf32>
      %355 = arith.addf %352, %354 : vector<8x128xf32>
      %356 = vector.broadcast %132 : f32 to vector<8x128xf32>
      %357 = arith.addf %355, %356 : vector<8x128xf32>
      %cst_308 = arith.constant 0.000000e+00 : f32
      %358 = vector.broadcast %cst_308 : f32 to vector<8x128xf32>
      %359 = arith.maximumf %357, %358 : vector<8x128xf32>
      %360 = vector.broadcast %60 : f32 to vector<8x128xf32>
      %361 = arith.mulf %360, %179 : vector<8x128xf32>
      %362 = vector.broadcast %61 : f32 to vector<8x128xf32>
      %363 = arith.mulf %362, %188 : vector<8x128xf32>
      %364 = arith.addf %361, %363 : vector<8x128xf32>
      %365 = vector.broadcast %62 : f32 to vector<8x128xf32>
      %366 = arith.mulf %365, %197 : vector<8x128xf32>
      %367 = arith.addf %364, %366 : vector<8x128xf32>
      %368 = vector.broadcast %63 : f32 to vector<8x128xf32>
      %369 = arith.mulf %368, %206 : vector<8x128xf32>
      %370 = arith.addf %367, %369 : vector<8x128xf32>
      %371 = vector.broadcast %64 : f32 to vector<8x128xf32>
      %372 = arith.mulf %371, %215 : vector<8x128xf32>
      %373 = arith.addf %370, %372 : vector<8x128xf32>
      %374 = vector.broadcast %65 : f32 to vector<8x128xf32>
      %375 = arith.mulf %374, %224 : vector<8x128xf32>
      %376 = arith.addf %373, %375 : vector<8x128xf32>
      %377 = vector.broadcast %66 : f32 to vector<8x128xf32>
      %378 = arith.mulf %377, %233 : vector<8x128xf32>
      %379 = arith.addf %376, %378 : vector<8x128xf32>
      %380 = vector.broadcast %67 : f32 to vector<8x128xf32>
      %381 = arith.mulf %380, %242 : vector<8x128xf32>
      %382 = arith.addf %379, %381 : vector<8x128xf32>
      %383 = vector.broadcast %68 : f32 to vector<8x128xf32>
      %384 = arith.mulf %383, %251 : vector<8x128xf32>
      %385 = arith.addf %382, %384 : vector<8x128xf32>
      %386 = vector.broadcast %69 : f32 to vector<8x128xf32>
      %387 = arith.mulf %386, %260 : vector<8x128xf32>
      %388 = arith.addf %385, %387 : vector<8x128xf32>
      %389 = vector.broadcast %133 : f32 to vector<8x128xf32>
      %390 = arith.addf %388, %389 : vector<8x128xf32>
      %cst_309 = arith.constant 0.000000e+00 : f32
      %391 = vector.broadcast %cst_309 : f32 to vector<8x128xf32>
      %392 = arith.maximumf %390, %391 : vector<8x128xf32>
      %393 = vector.broadcast %70 : f32 to vector<8x128xf32>
      %394 = arith.mulf %393, %179 : vector<8x128xf32>
      %395 = vector.broadcast %71 : f32 to vector<8x128xf32>
      %396 = arith.mulf %395, %188 : vector<8x128xf32>
      %397 = arith.addf %394, %396 : vector<8x128xf32>
      %398 = vector.broadcast %72 : f32 to vector<8x128xf32>
      %399 = arith.mulf %398, %197 : vector<8x128xf32>
      %400 = arith.addf %397, %399 : vector<8x128xf32>
      %401 = vector.broadcast %73 : f32 to vector<8x128xf32>
      %402 = arith.mulf %401, %206 : vector<8x128xf32>
      %403 = arith.addf %400, %402 : vector<8x128xf32>
      %404 = vector.broadcast %74 : f32 to vector<8x128xf32>
      %405 = arith.mulf %404, %215 : vector<8x128xf32>
      %406 = arith.addf %403, %405 : vector<8x128xf32>
      %407 = vector.broadcast %75 : f32 to vector<8x128xf32>
      %408 = arith.mulf %407, %224 : vector<8x128xf32>
      %409 = arith.addf %406, %408 : vector<8x128xf32>
      %410 = vector.broadcast %76 : f32 to vector<8x128xf32>
      %411 = arith.mulf %410, %233 : vector<8x128xf32>
      %412 = arith.addf %409, %411 : vector<8x128xf32>
      %413 = vector.broadcast %77 : f32 to vector<8x128xf32>
      %414 = arith.mulf %413, %242 : vector<8x128xf32>
      %415 = arith.addf %412, %414 : vector<8x128xf32>
      %416 = vector.broadcast %78 : f32 to vector<8x128xf32>
      %417 = arith.mulf %416, %251 : vector<8x128xf32>
      %418 = arith.addf %415, %417 : vector<8x128xf32>
      %419 = vector.broadcast %79 : f32 to vector<8x128xf32>
      %420 = arith.mulf %419, %260 : vector<8x128xf32>
      %421 = arith.addf %418, %420 : vector<8x128xf32>
      %422 = vector.broadcast %134 : f32 to vector<8x128xf32>
      %423 = arith.addf %421, %422 : vector<8x128xf32>
      %cst_310 = arith.constant 0.000000e+00 : f32
      %424 = vector.broadcast %cst_310 : f32 to vector<8x128xf32>
      %425 = arith.maximumf %423, %424 : vector<8x128xf32>
      %426 = vector.broadcast %80 : f32 to vector<8x128xf32>
      %427 = arith.mulf %426, %179 : vector<8x128xf32>
      %428 = vector.broadcast %81 : f32 to vector<8x128xf32>
      %429 = arith.mulf %428, %188 : vector<8x128xf32>
      %430 = arith.addf %427, %429 : vector<8x128xf32>
      %431 = vector.broadcast %82 : f32 to vector<8x128xf32>
      %432 = arith.mulf %431, %197 : vector<8x128xf32>
      %433 = arith.addf %430, %432 : vector<8x128xf32>
      %434 = vector.broadcast %83 : f32 to vector<8x128xf32>
      %435 = arith.mulf %434, %206 : vector<8x128xf32>
      %436 = arith.addf %433, %435 : vector<8x128xf32>
      %437 = vector.broadcast %84 : f32 to vector<8x128xf32>
      %438 = arith.mulf %437, %215 : vector<8x128xf32>
      %439 = arith.addf %436, %438 : vector<8x128xf32>
      %440 = vector.broadcast %85 : f32 to vector<8x128xf32>
      %441 = arith.mulf %440, %224 : vector<8x128xf32>
      %442 = arith.addf %439, %441 : vector<8x128xf32>
      %443 = vector.broadcast %86 : f32 to vector<8x128xf32>
      %444 = arith.mulf %443, %233 : vector<8x128xf32>
      %445 = arith.addf %442, %444 : vector<8x128xf32>
      %446 = vector.broadcast %87 : f32 to vector<8x128xf32>
      %447 = arith.mulf %446, %242 : vector<8x128xf32>
      %448 = arith.addf %445, %447 : vector<8x128xf32>
      %449 = vector.broadcast %88 : f32 to vector<8x128xf32>
      %450 = arith.mulf %449, %251 : vector<8x128xf32>
      %451 = arith.addf %448, %450 : vector<8x128xf32>
      %452 = vector.broadcast %89 : f32 to vector<8x128xf32>
      %453 = arith.mulf %452, %260 : vector<8x128xf32>
      %454 = arith.addf %451, %453 : vector<8x128xf32>
      %455 = vector.broadcast %135 : f32 to vector<8x128xf32>
      %456 = arith.addf %454, %455 : vector<8x128xf32>
      %cst_311 = arith.constant 0.000000e+00 : f32
      %457 = vector.broadcast %cst_311 : f32 to vector<8x128xf32>
      %458 = arith.maximumf %456, %457 : vector<8x128xf32>
      %459 = vector.broadcast %90 : f32 to vector<8x128xf32>
      %460 = arith.mulf %459, %179 : vector<8x128xf32>
      %461 = vector.broadcast %91 : f32 to vector<8x128xf32>
      %462 = arith.mulf %461, %188 : vector<8x128xf32>
      %463 = arith.addf %460, %462 : vector<8x128xf32>
      %464 = vector.broadcast %92 : f32 to vector<8x128xf32>
      %465 = arith.mulf %464, %197 : vector<8x128xf32>
      %466 = arith.addf %463, %465 : vector<8x128xf32>
      %467 = vector.broadcast %93 : f32 to vector<8x128xf32>
      %468 = arith.mulf %467, %206 : vector<8x128xf32>
      %469 = arith.addf %466, %468 : vector<8x128xf32>
      %470 = vector.broadcast %94 : f32 to vector<8x128xf32>
      %471 = arith.mulf %470, %215 : vector<8x128xf32>
      %472 = arith.addf %469, %471 : vector<8x128xf32>
      %473 = vector.broadcast %95 : f32 to vector<8x128xf32>
      %474 = arith.mulf %473, %224 : vector<8x128xf32>
      %475 = arith.addf %472, %474 : vector<8x128xf32>
      %476 = vector.broadcast %96 : f32 to vector<8x128xf32>
      %477 = arith.mulf %476, %233 : vector<8x128xf32>
      %478 = arith.addf %475, %477 : vector<8x128xf32>
      %479 = vector.broadcast %97 : f32 to vector<8x128xf32>
      %480 = arith.mulf %479, %242 : vector<8x128xf32>
      %481 = arith.addf %478, %480 : vector<8x128xf32>
      %482 = vector.broadcast %98 : f32 to vector<8x128xf32>
      %483 = arith.mulf %482, %251 : vector<8x128xf32>
      %484 = arith.addf %481, %483 : vector<8x128xf32>
      %485 = vector.broadcast %99 : f32 to vector<8x128xf32>
      %486 = arith.mulf %485, %260 : vector<8x128xf32>
      %487 = arith.addf %484, %486 : vector<8x128xf32>
      %488 = vector.broadcast %136 : f32 to vector<8x128xf32>
      %489 = arith.addf %487, %488 : vector<8x128xf32>
      %cst_312 = arith.constant 0.000000e+00 : f32
      %490 = vector.broadcast %cst_312 : f32 to vector<8x128xf32>
      %491 = arith.maximumf %489, %490 : vector<8x128xf32>
      %492 = vector.broadcast %100 : f32 to vector<8x128xf32>
      %493 = arith.mulf %492, %179 : vector<8x128xf32>
      %494 = vector.broadcast %101 : f32 to vector<8x128xf32>
      %495 = arith.mulf %494, %188 : vector<8x128xf32>
      %496 = arith.addf %493, %495 : vector<8x128xf32>
      %497 = vector.broadcast %102 : f32 to vector<8x128xf32>
      %498 = arith.mulf %497, %197 : vector<8x128xf32>
      %499 = arith.addf %496, %498 : vector<8x128xf32>
      %500 = vector.broadcast %103 : f32 to vector<8x128xf32>
      %501 = arith.mulf %500, %206 : vector<8x128xf32>
      %502 = arith.addf %499, %501 : vector<8x128xf32>
      %503 = vector.broadcast %104 : f32 to vector<8x128xf32>
      %504 = arith.mulf %503, %215 : vector<8x128xf32>
      %505 = arith.addf %502, %504 : vector<8x128xf32>
      %506 = vector.broadcast %105 : f32 to vector<8x128xf32>
      %507 = arith.mulf %506, %224 : vector<8x128xf32>
      %508 = arith.addf %505, %507 : vector<8x128xf32>
      %509 = vector.broadcast %106 : f32 to vector<8x128xf32>
      %510 = arith.mulf %509, %233 : vector<8x128xf32>
      %511 = arith.addf %508, %510 : vector<8x128xf32>
      %512 = vector.broadcast %107 : f32 to vector<8x128xf32>
      %513 = arith.mulf %512, %242 : vector<8x128xf32>
      %514 = arith.addf %511, %513 : vector<8x128xf32>
      %515 = vector.broadcast %108 : f32 to vector<8x128xf32>
      %516 = arith.mulf %515, %251 : vector<8x128xf32>
      %517 = arith.addf %514, %516 : vector<8x128xf32>
      %518 = vector.broadcast %109 : f32 to vector<8x128xf32>
      %519 = arith.mulf %518, %260 : vector<8x128xf32>
      %520 = arith.addf %517, %519 : vector<8x128xf32>
      %521 = vector.broadcast %137 : f32 to vector<8x128xf32>
      %522 = arith.addf %520, %521 : vector<8x128xf32>
      %cst_313 = arith.constant 0.000000e+00 : f32
      %523 = vector.broadcast %cst_313 : f32 to vector<8x128xf32>
      %524 = arith.maximumf %522, %523 : vector<8x128xf32>
      %525 = vector.broadcast %110 : f32 to vector<8x128xf32>
      %526 = arith.mulf %525, %179 : vector<8x128xf32>
      %527 = vector.broadcast %111 : f32 to vector<8x128xf32>
      %528 = arith.mulf %527, %188 : vector<8x128xf32>
      %529 = arith.addf %526, %528 : vector<8x128xf32>
      %530 = vector.broadcast %112 : f32 to vector<8x128xf32>
      %531 = arith.mulf %530, %197 : vector<8x128xf32>
      %532 = arith.addf %529, %531 : vector<8x128xf32>
      %533 = vector.broadcast %113 : f32 to vector<8x128xf32>
      %534 = arith.mulf %533, %206 : vector<8x128xf32>
      %535 = arith.addf %532, %534 : vector<8x128xf32>
      %536 = vector.broadcast %114 : f32 to vector<8x128xf32>
      %537 = arith.mulf %536, %215 : vector<8x128xf32>
      %538 = arith.addf %535, %537 : vector<8x128xf32>
      %539 = vector.broadcast %115 : f32 to vector<8x128xf32>
      %540 = arith.mulf %539, %224 : vector<8x128xf32>
      %541 = arith.addf %538, %540 : vector<8x128xf32>
      %542 = vector.broadcast %116 : f32 to vector<8x128xf32>
      %543 = arith.mulf %542, %233 : vector<8x128xf32>
      %544 = arith.addf %541, %543 : vector<8x128xf32>
      %545 = vector.broadcast %117 : f32 to vector<8x128xf32>
      %546 = arith.mulf %545, %242 : vector<8x128xf32>
      %547 = arith.addf %544, %546 : vector<8x128xf32>
      %548 = vector.broadcast %118 : f32 to vector<8x128xf32>
      %549 = arith.mulf %548, %251 : vector<8x128xf32>
      %550 = arith.addf %547, %549 : vector<8x128xf32>
      %551 = vector.broadcast %119 : f32 to vector<8x128xf32>
      %552 = arith.mulf %551, %260 : vector<8x128xf32>
      %553 = arith.addf %550, %552 : vector<8x128xf32>
      %554 = vector.broadcast %138 : f32 to vector<8x128xf32>
      %555 = arith.addf %553, %554 : vector<8x128xf32>
      %cst_314 = arith.constant 0.000000e+00 : f32
      %556 = vector.broadcast %cst_314 : f32 to vector<8x128xf32>
      %557 = arith.maximumf %555, %556 : vector<8x128xf32>
      %558 = vector.broadcast %120 : f32 to vector<8x128xf32>
      %559 = arith.mulf %558, %179 : vector<8x128xf32>
      %560 = vector.broadcast %121 : f32 to vector<8x128xf32>
      %561 = arith.mulf %560, %188 : vector<8x128xf32>
      %562 = arith.addf %559, %561 : vector<8x128xf32>
      %563 = vector.broadcast %122 : f32 to vector<8x128xf32>
      %564 = arith.mulf %563, %197 : vector<8x128xf32>
      %565 = arith.addf %562, %564 : vector<8x128xf32>
      %566 = vector.broadcast %123 : f32 to vector<8x128xf32>
      %567 = arith.mulf %566, %206 : vector<8x128xf32>
      %568 = arith.addf %565, %567 : vector<8x128xf32>
      %569 = vector.broadcast %124 : f32 to vector<8x128xf32>
      %570 = arith.mulf %569, %215 : vector<8x128xf32>
      %571 = arith.addf %568, %570 : vector<8x128xf32>
      %572 = vector.broadcast %125 : f32 to vector<8x128xf32>
      %573 = arith.mulf %572, %224 : vector<8x128xf32>
      %574 = arith.addf %571, %573 : vector<8x128xf32>
      %575 = vector.broadcast %126 : f32 to vector<8x128xf32>
      %576 = arith.mulf %575, %233 : vector<8x128xf32>
      %577 = arith.addf %574, %576 : vector<8x128xf32>
      %578 = vector.broadcast %127 : f32 to vector<8x128xf32>
      %579 = arith.mulf %578, %242 : vector<8x128xf32>
      %580 = arith.addf %577, %579 : vector<8x128xf32>
      %581 = vector.broadcast %128 : f32 to vector<8x128xf32>
      %582 = arith.mulf %581, %251 : vector<8x128xf32>
      %583 = arith.addf %580, %582 : vector<8x128xf32>
      %584 = vector.broadcast %129 : f32 to vector<8x128xf32>
      %585 = arith.mulf %584, %260 : vector<8x128xf32>
      %586 = arith.addf %583, %585 : vector<8x128xf32>
      %587 = vector.broadcast %139 : f32 to vector<8x128xf32>
      %588 = arith.addf %586, %587 : vector<8x128xf32>
      %cst_315 = arith.constant 0.000000e+00 : f32
      %589 = vector.broadcast %cst_315 : f32 to vector<8x128xf32>
      %590 = arith.maximumf %588, %589 : vector<8x128xf32>
      %591 = vector.broadcast %140 : f32 to vector<8x128xf32>
      %592 = arith.mulf %591, %293 : vector<8x128xf32>
      %593 = vector.broadcast %141 : f32 to vector<8x128xf32>
      %594 = arith.mulf %593, %326 : vector<8x128xf32>
      %595 = arith.addf %592, %594 : vector<8x128xf32>
      %596 = vector.broadcast %142 : f32 to vector<8x128xf32>
      %597 = arith.mulf %596, %359 : vector<8x128xf32>
      %598 = arith.addf %595, %597 : vector<8x128xf32>
      %599 = vector.broadcast %143 : f32 to vector<8x128xf32>
      %600 = arith.mulf %599, %392 : vector<8x128xf32>
      %601 = arith.addf %598, %600 : vector<8x128xf32>
      %602 = vector.broadcast %144 : f32 to vector<8x128xf32>
      %603 = arith.mulf %602, %425 : vector<8x128xf32>
      %604 = arith.addf %601, %603 : vector<8x128xf32>
      %605 = vector.broadcast %145 : f32 to vector<8x128xf32>
      %606 = arith.mulf %605, %458 : vector<8x128xf32>
      %607 = arith.addf %604, %606 : vector<8x128xf32>
      %608 = vector.broadcast %146 : f32 to vector<8x128xf32>
      %609 = arith.mulf %608, %491 : vector<8x128xf32>
      %610 = arith.addf %607, %609 : vector<8x128xf32>
      %611 = vector.broadcast %147 : f32 to vector<8x128xf32>
      %612 = arith.mulf %611, %524 : vector<8x128xf32>
      %613 = arith.addf %610, %612 : vector<8x128xf32>
      %614 = vector.broadcast %148 : f32 to vector<8x128xf32>
      %615 = arith.mulf %614, %557 : vector<8x128xf32>
      %616 = arith.addf %613, %615 : vector<8x128xf32>
      %617 = vector.broadcast %149 : f32 to vector<8x128xf32>
      %618 = arith.mulf %617, %590 : vector<8x128xf32>
      %619 = arith.addf %616, %618 : vector<8x128xf32>
      %620 = vector.broadcast %160 : f32 to vector<8x128xf32>
      %621 = arith.addf %619, %620 : vector<8x128xf32>
      %cst_316 = arith.constant 0.000000e+00 : f32
      %622 = vector.broadcast %cst_316 : f32 to vector<8x128xf32>
      %623 = arith.maximumf %621, %622 : vector<8x128xf32>
      %c0_317 = arith.constant 0 : index
      %624 = arith.index_cast %164 : i32 to index
      %c0_318 = arith.constant 0 : index
      %625 = vector.load %arg8[%c0_317, %624, %c0_318] : memref<2x16x128xf32, #tpu.memory_space<vmem>>, vector<1x8x128xf32>
      %626 = vector.shape_cast %625 : vector<1x8x128xf32> to vector<8x128xf32>
      %627 = vector.shape_cast %623 : vector<8x128xf32> to vector<1x8x128xf32>
      tpu.vector_store %arg8[%c0_317, %624, %c0_318], %627 {strides = array<i32>} : memref<2x16x128xf32, #tpu.memory_space<vmem>>, vector<1x8x128xf32>,
      %628 = vector.broadcast %150 : f32 to vector<8x128xf32>
      %629 = arith.mulf %628, %293 : vector<8x128xf32>
      %630 = vector.broadcast %151 : f32 to vector<8x128xf32>
      %631 = arith.mulf %630, %326 : vector<8x128xf32>
      %632 = arith.addf %629, %631 : vector<8x128xf32>
      %633 = vector.broadcast %152 : f32 to vector<8x128xf32>
      %634 = arith.mulf %633, %359 : vector<8x128xf32>
      %635 = arith.addf %632, %634 : vector<8x128xf32>
      %636 = vector.broadcast %153 : f32 to vector<8x128xf32>
      %637 = arith.mulf %636, %392 : vector<8x128xf32>
      %638 = arith.addf %635, %637 : vector<8x128xf32>
      %639 = vector.broadcast %154 : f32 to vector<8x128xf32>
      %640 = arith.mulf %639, %425 : vector<8x128xf32>
      %641 = arith.addf %638, %640 : vector<8x128xf32>
      %642 = vector.broadcast %155 : f32 to vector<8x128xf32>
      %643 = arith.mulf %642, %458 : vector<8x128xf32>
      %644 = arith.addf %641, %643 : vector<8x128xf32>
      %645 = vector.broadcast %156 : f32 to vector<8x128xf32>
      %646 = arith.mulf %645, %491 : vector<8x128xf32>
      %647 = arith.addf %644, %646 : vector<8x128xf32>
      %648 = vector.broadcast %157 : f32 to vector<8x128xf32>
      %649 = arith.mulf %648, %524 : vector<8x128xf32>
      %650 = arith.addf %647, %649 : vector<8x128xf32>
      %651 = vector.broadcast %158 : f32 to vector<8x128xf32>
      %652 = arith.mulf %651, %557 : vector<8x128xf32>
      %653 = arith.addf %650, %652 : vector<8x128xf32>
      %654 = vector.broadcast %159 : f32 to vector<8x128xf32>
      %655 = arith.mulf %654, %590 : vector<8x128xf32>
      %656 = arith.addf %653, %655 : vector<8x128xf32>
      %657 = vector.broadcast %161 : f32 to vector<8x128xf32>
      %658 = arith.addf %656, %657 : vector<8x128xf32>
      %cst_319 = arith.constant 0.000000e+00 : f32
      %659 = vector.broadcast %cst_319 : f32 to vector<8x128xf32>
      %660 = arith.maximumf %658, %659 : vector<8x128xf32>
      %c1_320 = arith.constant 1 : index
      %661 = arith.index_cast %164 : i32 to index
      %c0_321 = arith.constant 0 : index
      %662 = vector.load %arg8[%c1_320, %661, %c0_321] : memref<2x16x128xf32, #tpu.memory_space<vmem>>, vector<1x8x128xf32>
      %663 = vector.shape_cast %662 : vector<1x8x128xf32> to vector<8x128xf32>
      %664 = vector.shape_cast %660 : vector<8x128xf32> to vector<1x8x128xf32>
      tpu.vector_store %arg8[%c1_320, %661, %c0_321], %664 {strides = array<i32>} : memref<2x16x128xf32, #tpu.memory_space<vmem>>, vector<1x8x128xf32>,
    }
    %c2_i32_292 = arith.constant 2 : i32
    return
  }
  func.func @transform_0(%arg0: i32) -> (i32, i32, i32) {
    %c0_i32 = arith.constant 0 : i32
    %c0_i32_0 = arith.constant 0 : i32
    %c0_i32_1 = arith.constant 0 : i32
    return %c0_i32, %arg0, %c0_i32_0 : i32, i32, i32
  }
  func.func @transform_1(%arg0: i32) -> (i32, i32) {
    %c0_i32 = arith.constant 0 : i32
    %c0_i32_0 = arith.constant 0 : i32
    %c0_i32_1 = arith.constant 0 : i32
    return %c0_i32, %c0_i32_0 : i32, i32
  }
  func.func @transform_2(%arg0: i32) -> i32 {
    %c0_i32 = arith.constant 0 : i32
    %c0_i32_0 = arith.constant 0 : i32
    return %c0_i32 : i32
  }
  func.func @transform_3(%arg0: i32) -> (i32, i32) {
    %c0_i32 = arith.constant 0 : i32
    %c0_i32_0 = arith.constant 0 : i32
    %c0_i32_1 = arith.constant 0 : i32
    return %c0_i32, %c0_i32_0 : i32, i32
  }
  func.func @transform_4(%arg0: i32) -> i32 {
    %c0_i32 = arith.constant 0 : i32
    %c0_i32_0 = arith.constant 0 : i32
    return %c0_i32 : i32
  }
  func.func @transform_5(%arg0: i32) -> (i32, i32) {
    %c0_i32 = arith.constant 0 : i32
    %c0_i32_0 = arith.constant 0 : i32
    %c0_i32_1 = arith.constant 0 : i32
    return %c0_i32, %c0_i32_0 : i32, i32
  }
  func.func @transform_6(%arg0: i32) -> i32 {
    %c0_i32 = arith.constant 0 : i32
    %c0_i32_0 = arith.constant 0 : i32
    return %c0_i32 : i32
  }
  func.func @transform_7(%arg0: i32) -> (i32, i32, i32) {
    %c0_i32 = arith.constant 0 : i32
    %c0_i32_0 = arith.constant 0 : i32
    %c0_i32_1 = arith.constant 0 : i32
    return %c0_i32, %arg0, %c0_i32_0 : i32, i32, i32
  }
}

</mosaic_0001>

<bundles_post_ra>
// kernel: simple_nn_forward.1
= control target key start
LH: loop header
LB: loop body
LE: loop exit
PB: predicated region body
PF: predicated region fallthrough
CT: control target
= control target key end

     0   :  { %s3144_s0 = inlined_call_operand.vmem [shape: f32[2,24,128], index: 0, kind: input, shape index: {}]   ;;  %s3145_s1 = inlined_call_operand.vmem [shape: f32[10,2], index: 1, kind: input, shape index: {}]   ;;  %s3146_s2 = inlined_call_operand.vmem [shape: f32[10], index: 2, kind: input, shape index: {}]   ;;  %s3147_s3 = inlined_call_operand.vmem [shape: f32[10,10], index: 3, kind: input, shape index: {}]   ;;  %s3148_s4 = inlined_call_operand.vmem [shape: f32[10], index: 4, kind: input, shape index: {}]   ;;  %s3149_s5 = inlined_call_operand.vmem [shape: f32[2,10], index: 5, kind: input, shape index: {}]   ;;  %s3150_s6 = inlined_call_operand.vmem [shape: f32[2], index: 6, kind: input, shape index: {}]   ;;  %s3151_s7 = inlined_call_operand.vmem [shape: f32[2,24,128], index: 7, kind: output, shape index: {}]  }
   0x1   :  { %3160 = sst [smem:[#allocation170_spill]] %s3144_s0 }
   0x2   :  { %3161 = sst [smem:[#allocation171_spill]] %s3145_s1 }
   0x3   :  { %3162 = sst [smem:[#allocation172_spill]] %s3146_s2 }
   0x4   :  { %3163 = sst [smem:[#allocation173_spill]] %s3147_s3 }
   0x5   :  { %3164 = sst [smem:[#allocation174_spill]] %s3148_s4 }
   0x6   :  { %3165 = sst [smem:[#allocation175_spill]] %s3149_s5 }
   0x7   :  { %3166 = sst [smem:[#allocation176_spill]] %s3150_s6 }
   0x8   :  { %3167 = sst [smem:[#allocation177_spill]] %s3151_s7 }
   0x9   :  { %12 = vsyncpa [#allocation4], 0 }
   0xa   :  { %13 = vsyncpa [#allocation6], 0 }
   0xb   :  { %14 = vsyncpa [#allocation9], 0 }
   0xc   :  { %15 = vsyncpa [#allocation12], 0  ;;  %s2247_s24 = smov 0   ;;  %s2249_s25 = smov 0  }
   0xd   :  { %s2251_s26 = smov 0  }
   0xe LB: > { %3168 = sst [smem:[#allocation18_spill]] %s2125_s25  ;;  %s2263_s27 = sadd.s32 4294967295, %s2129_s26   ;;  %s2129_s26 = sphi %s2251_s26, %s3491_s26   ;;  %s2125_s25 = sphi %s2249_s25, %s3493_s25   ;;  %s2121_s24 = sphi %s2247_s24, %s3492_s24  }
   0xf   : > { %3169 = sst [smem:[#allocation19_spill]] %s2263_s27  ;;  %s2266_s28 = sadd.s32 1, %s2129_s26  }
  0x10   : > { %3170 = sst [smem:[#allocation20_spill]] %s2266_s28  ;;  %s25_s29 = ssub.s32 %s2129_s26, %s2266_s28 }
  0x11   : > { %s28_s30 = sadd.s32 1, %s2125_s25  ;;  %p26_p0 = scmp.eq.s32.totalorder %s25_s29, 0 }
  0x12   : > { %p35_p1 = scmp.ne.s32.totalorder %s2125_s25, %s2121_s24  ;;  %p36_p2 = scmp.eq.s32.totalorder %s2129_s26, 0 }
  0x13   : > { %p191_p3 = scmp.eq.s32.totalorder %s2263_s27, 1  ;;  %p1494_p6 = scmp.ge.s32.totalorder %s2129_s26, 1 }
  0x14   : > { %s2276_s8 = scalar_select %p26_p0, %s2125_s25, %s28_s30  }
  0x15   : > { %p2278_p4 = por %p36_p2, %p35_p1  ;;  %p2282_p5 = por %p191_p3, %p35_p1 }
  0x16   : > { %3171 = sst [smem:[#allocation21_spill]] %s2276_s8  ;;  %p204_p7 = scmp.lt.s32.totalorder %s2129_s26, 3 }
  0x17   : > { %s3173_s10 = scalar_select %p2282_p5, 1, 0 }
  0x18   : > { %p1753_p8 = scmp.eq.s32.totalorder %s2263_s27, 0  ;;  %p2289_p9 = pnand %p1494_p6, %p204_p7 }
  0x19   : > { %3174 = sst [smem:[#allocation22_spill]] %s3173_s10  ;;  %s2199_s22 = smov [#allocation5]  }
  0x1a   : > { %s3176_s2 = sld [smem:[#allocation172_spill]]  ;;  %p1734_p10 = pneg %p2289_p9 }
  0x1b   : > { %s3177_s4 = sld [smem:[#allocation174_spill]]  ;;  %s2200_s23 = smov [#allocation8]  }
  0x1c   : > { %p2303_p11 = pnand %p1753_p8, %p1734_p10  ;;  %s3179_s1 = sld [smem:[#allocation171_spill]] }
  0x1d   : > { %s3180_s3 = sld [smem:[#allocation173_spill]]  ;;  %s2201_s13 = smov [#allocation3]  }
  0x1e   : > { %s2202_s15 = smov 128   ;;  %s2203_s16 = smov 8  }
  0x1f   : > { %s2204_s19 = smov [#allocation7]   ;;  %s3181_s5 = sld [smem:[#allocation175_spill]] }
  0x20   : > { %s228_s14 = sshll.u32 %s3176_s2, 4  ;;  %s3182_s6 = sld [smem:[#allocation176_spill]]  ;;  %s229_s14 = int_to_ptr.vmem [resolvable:$true] %s228_s14 }
  0x21   : > { %s250_s17 = sshll.u32 %s3177_s4, 4  ;;  %s2205_s29 = smov [#allocation10]   ;;  %s251_s17 = int_to_ptr.vmem [resolvable:$true] %s250_s17 }
  0x22   : > { %s215_s21 = sshll.u32 %s3179_s1, 4  ;;  %s2206_s30 = smov [#allocation11]   ;;  %s216_s21 = int_to_ptr.vmem [resolvable:$true] %s215_s21 }
  0x23   : > { %1740 = dma.vmem_to_smem (!%p2303_p11), %s229_s14, 16, %s2199_s22, [#allocation6]  }
  0x24   : > { %1746 = dma.vmem_to_smem (!%p2303_p11), %s251_s17, 16, %s2200_s23, [#allocation9]  }
  0x25   : > { %s237_s12 = sshll.u32 %s3180_s3, 4  ;;  %s260_s14 = sshll.u32 %s3181_s5, 4  ;;  %s238_s12 = int_to_ptr.vmem [resolvable:$true] %s237_s12  ;;  %s261_s14 = int_to_ptr.vmem [resolvable:$true] %s260_s14 }
  0x26   : > { %1737 = dma.vmem_to_smem (!%p2303_p11), %s216_s21, 256, %s2201_s13, [#allocation4], %s2202_s15, %s2202_s15, %s2203_s16  }
  0x27   : > { %1743 = dma.vmem_to_smem (!%p2303_p11), %s238_s12, 256, %s2204_s19, [#allocation6], %s2202_s15, %s2202_s15, %s2203_s16  }
  0x28   : > { %s270_s23 = sshll.u32 %s3182_s6, 4  ;;  %p1501_p12 = scmp.ge.s32.totalorder %s2129_s26, 2  ;;  %s271_s23 = int_to_ptr.vmem [resolvable:$true] %s270_s23 }
  0x29   : > { %1749 = dma.vmem_to_smem (!%p2303_p11), %s261_s14, 32, %s2205_s29, [#allocation9]  }
  0x2a   : > { %1752 = dma.vmem_to_smem (!%p2303_p11), %s271_s23, 16, %s2206_s30, [#allocation12]  }
  0x2b   : > { %277 = sbr.rel (%p1501_p12) target bundleno = 92 (0x5c), region = 40 }
  0x30   : > { %280 = sbr.rel (!%p2278_p4) target bundleno = 92 (0x5c), region = 44  ;;  %s282_s1 = sand.u32 (%p2278_p4), 1, %s2125_s25  }
  0x31   : > { %s1503_s21 = sshll.u32 (%p2278_p4), %s2129_s26, 1  ;;  %s1502_s12 = sshll.u32 (%p2278_p4), %s282_s1, 5 }
  0x32   : > { %s286_s13 = ssub.s32 (%p2278_p4), 3, %s1503_s21  ;;  %s1704_s15 = sshll.u32 (%p2278_p4), %s2129_s26, 4 }
  0x33   : > { %p287_p13 = scmp.lt.s32.totalorder (%p2278_p4), %s286_s13, 2  ;;  %s3183_s0 = sld [smem:[#allocation170_spill]] (%p2278_p4) }
  0x34   : > { %s2345_s9 = scalar_lea.vmem (%p2278_p4), [#allocation2], %s1502_s12  }
  0x35   : > { %s3495_s13 = smov (!%p287_p13, %s286_s13), 2 }
  0x36   : > { %s1504_s20 = sshll.u32 %s3495_s13, 4 }
  0x37   : > { %p1507_p0 = scmp.eq.s32.totalorder %s1504_s20, 0 }
  0x38   : > { %s2348_s14 = sshrl.u32 (!%p1507_p0), %s3495_s13, 1 }
  0x39   : > { %s2342_s19 = scalar_lea.vmem %s3183_s0, %s1704_s15   ;;  %295 = sbr.rel (%p1507_p0) target bundleno = 92 (0x5c), region = 48 }
  0x3a   : > { %p1508_p1 = scmp.le.s32.totalorder (!%p1507_p0), %s2348_s14, 0 }
  0x3e   : > { %1362 = sbr.rel (%p1508_p1) target bundleno = 75 (0x4b), region = 233  ;;  %s3184_s26 = smov (!%p1508_p1), %s2345_s9 }
  0x3f   : > { %s3185_s17 = smov (!%p1508_p1), %s2342_s19  ;;  %s2357_s22 = smov (!%p1508_p1), 0  }
  0x40   : > { %s2143_s23 = smov (!%p1508_p1), 0  }
  0x43 LB: >> { %v366_v0 = vld [vmem:[%s2137_s17] sm:$0xff]  ;;  %v368_v1 = vld [vmem:[%s2137_s17 + $0x8] sm:$0xff]  ;;  %v370_v2 = vld [vmem:[%s2137_s17 + $0x18] sm:$0xff]  ;;  %s374_s29 = sadd.s32 1, %s2141_s22  ;;  %s360_s23 = sadd.s32 1, %s2145_s23   ;;  %s2145_s23 = sphi %s2143_s23, %s360_s23   ;;  %s2141_s22 = sphi %s2357_s22, %s3186_s22   ;;  %s2137_s17 = sphi %s3185_s17, %s379_s17   ;;  %s2133_s26 = sphi %s3184_s26, %s380_s26  }
  0x44   : >> { %367 = vst [vmem:[%s2133_s26] sm:$0xff] %v366_v0  ;;  %v372_v3 = vld [vmem:[%s2137_s17 + $0x20] sm:$0xff]  ;;  %p375_p2 = scmp.ge.s32.totalorder %s374_s29, %s2348_s14  ;;  %p359_p3 = scmp.ge.s32.totalorder %s360_s23, %s2348_s14 }
  0x45   : >> { %369 = vst [vmem:[%s2133_s26 + $0x8] sm:$0xff] %v368_v1 }
  0x46   : >> { %371 = vst [vmem:[%s2133_s26 + $0x10] sm:$0xff] %v370_v2  ;;  %s3497_s29 = smov (%p375_p2, %s374_s29), 0  ;;  %362 = sbr.rel (!%p359_p3) target bundleno = 67 (0x43), region = 239 }
  0x47   : >> { %373 = vst [vmem:[%s2133_s26 + $0x18] sm:$0xff] %v372_v3  ;;  %s1509_s30 = sshll.u32 %s3497_s29, 4  ;;  %s3186_s22 = smov %s3497_s29 }
  0x48   : >> { %s379_s17 = scalar_lea.vmem %s2342_s19, %s1509_s30   ;;  %s380_s26 = scalar_lea.vmem %s2345_s9, %s1509_s30 [#allocation2]  }
  0x4b PF: > { %s2373_s1 = sand.u32 1, %s3495_s13   ;;  %s1705_s21 = sshll.u32 %s2348_s14, 4 }
  0x4c   : > { %s2377_s12 = scalar_lea.vmem %s2342_s19, %s1705_s21   ;;  %s387_s15 = scalar_lea.vmem %s2345_s9, %s1705_s21 [#allocation2]  }
  0x4d   : > { %p1514_p4 = scmp.le.s32.totalorder %s2373_s1, 0 }
  0x4e   : > { %s2147_s16 = smov (!%p1514_p4), %s387_s15   ;;  %s2151_s18 = smov (!%p1514_p4), %s2377_s12  }
  0x4f   : > { %1376 = sbr.rel (%p1514_p4) target bundleno = 92 (0x5c), region = 244  ;;  %s2155_s20 = smov (!%p1514_p4), 0  }
  0x50   : > { %s2159_s22 = smov (!%p1514_p4), 0  }
  0x54 LB: >> { %v397_v4 = vld [vmem:[%s2153_s18] sm:$0xff]  ;;  %v399_v5 = vld [vmem:[%s2153_s18 + $0x18] sm:$0xff]  ;;  %s401_s13 = sadd.s32 1, %s2157_s20  ;;  %s391_s22 = sadd.s32 1, %s2161_s22   ;;  %s2161_s22 = sphi %s2159_s22, %s391_s22   ;;  %s2157_s20 = sphi %s2155_s20, %s2156_s20   ;;  %s2153_s18 = sphi %s2151_s18, %s406_s18   ;;  %s2149_s16 = sphi %s2147_s16, %s407_s16  }
  0x55   : >> { %398 = vst [vmem:[%s2149_s16] sm:$0xff] %v397_v4  ;;  %p402_p6 = scmp.ge.s32.totalorder %s401_s13, %s2373_s1  ;;  %p390_p7 = scmp.ge.s32.totalorder %s391_s22, %s2373_s1 }
  0x56   : >> { %400 = vst [vmem:[%s2149_s16 + $0x10] sm:$0xff] %v399_v5 }
  0x57   : >> { %s3499_s13 = smov (%p402_p6, %s401_s13), 0  ;;  %393 = sbr.rel (!%p390_p7) target bundleno = 84 (0x54), region = 250 }
  0x58   : >> { %s1515_s19 = sshll.u32 %s3499_s13, 3  ;;  %s2156_s20 = smov %s3499_s13  }
  0x59   : >> { %s406_s18 = scalar_lea.vmem %s2377_s12, %s1515_s19   ;;  %s407_s16 = scalar_lea.vmem %s387_s15, %s1515_s19 [#allocation2]  }
  0x5c PF: > { %416 = sbr.rel (%p2289_p9) target bundleno = 641 (0x281), region = 96 }
  0x61   : > { %s419_s9 = sand.u32 1, %s2121_s24  }
  0x62   : > { %s2388_s14 = sshll.u32 %s419_s9, 5 }
  0x63   : > { %3187 = sst [smem:[#allocation23_spill]] %s2388_s14 }
  0x64   : > { %2104 = dma.done.wait (%p1753_p8), [#allocation4], 256  }
  0x65   : > { %2106 = vsyncadd (%p1753_p8), [#allocation4], 4294967040 }
  0x66   : > { %2108 = dma.done.wait (%p1753_p8), [#allocation6], 272  }
  0x67   : > { %2110 = vsyncadd (%p1753_p8), [#allocation6], 4294967024 }
  0x68   : > { %2112 = dma.done.wait (%p1753_p8), [#allocation9], 48  }
  0x69   : > { %2114 = vsyncadd (%p1753_p8), [#allocation9], 4294967248 }
  0x6a   : > { %2116 = dma.done.wait (%p1753_p8), [#allocation12], 16  }
  0x6b   : > { %2118 = vsyncadd (%p1753_p8), [#allocation12], 4294967280 }
  0x6c   : > { %455 = sfence }
  0x6d   : > { %s2407_s24 = sld [smem:[#allocation3]] }
  0x6e   : > { %s2409_s11 = sld [smem:[#allocation3 + $0x1]] }
  0x6f   : > { %s2411_s17 = sld [smem:[#allocation3 + $0x80]] }
  0x70   : > { %s2413_s23 = sld [smem:[#allocation3 + $0x81]] }
  0x71   : > { %s2415_s29 = sld [smem:[#allocation3 + $0x100]] }
  0x72   : > { %s2417_s30 = sld [smem:[#allocation3 + $0x101]] }
  0x73   : > { %s2419_s1 = sld [smem:[#allocation3 + $0x180]] }
  0x74   : > { %3188 = sst [smem:[#allocation24_spill]] %s2409_s11 }
  0x75   : > { %s2421_s21 = sld [smem:[#allocation3 + $0x181]] }
  0x76   : > { %s2423_s12 = sld [smem:[#allocation3 + $0x200]] }
  0x77   : > { %s2425_s15 = sld [smem:[#allocation3 + $0x201]] }
  0x78   : > { %s2427_s16 = sld [smem:[#allocation3 + $0x280]] }
  0x79   : > { %3189 = sst [smem:[#allocation25_spill]] %s2419_s1 }
  0x7a   : > { %s2429_s18 = sld [smem:[#allocation3 + $0x281]] }
  0x7b   : > { %s2431_s20 = sld [smem:[#allocation3 + $0x300]] }
  0x7c   : > { %3190 = sst [smem:[#allocation26_spill]] %s2423_s12 }
  0x7d   : > { %3191 = sst [smem:[#allocation27_spill]] %s2425_s15 }
  0x7e   : > { %s2433_s22 = sld [smem:[#allocation3 + $0x301]] }
  0x7f   : > { %s2435_s13 = sld [smem:[#allocation3 + $0x380]] }
  0x80   : > { %s2437_s19 = sld [smem:[#allocation3 + $0x381]] }
  0x81   : > { %s2439_s9 = sld [smem:[#allocation3 + $0x400]] }
  0x82   : > { %s2441_s26 = sld [smem:[#allocation3 + $0x401]] }
  0x83   : > { %s2443_s0 = sld [smem:[#allocation3 + $0x480]] }
  0x84   : > { %3192 = sst [smem:[#allocation28_spill]] %s2433_s22 }
  0x85   : > { %3193 = sst [smem:[#allocation29_spill]] %s2435_s13 }
  0x86   : > { %3194 = sst [smem:[#allocation30_spill]] %s2437_s19 }
  0x87   : > { %3195 = sst [smem:[#allocation31_spill]] %s2439_s9 }
  0x88   : > { %3196 = sst [smem:[#allocation32_spill]] %s2441_s26 }
  0x89   : > { %3197 = sst [smem:[#allocation33_spill]] %s2443_s0 }
  0x8a   : > { %s2445_s2 = sld [smem:[#allocation3 + $0x481]] }
  0x8b   : > { %s2447_s3 = sld [smem:[#allocation5]] }
  0x8c   : > { %s2449_s4 = sld [smem:[#allocation5 + $0x1]] }
  0x8d   : > { %s2451_s5 = sld [smem:[#allocation5 + $0x2]] }
  0x8e   : > { %s2453_s6 = sld [smem:[#allocation5 + $0x3]] }
  0x8f   : > { %s2455_s8 = sld [smem:[#allocation5 + $0x4]] }
  0x90   : > { %3198 = sst [smem:[#allocation34_spill]] %s2445_s2 }
  0x91   : > { %3199 = sst [smem:[#allocation35_spill]] %s2447_s3 }
  0x92   : > { %3200 = sst [smem:[#allocation36_spill]] %s2449_s4 }
  0x93   : > { %3201 = sst [smem:[#allocation37_spill]] %s2451_s5 }
  0x94   : > { %3202 = sst [smem:[#allocation38_spill]] %s2453_s6 }
  0x95   : > { %3203 = sst [smem:[#allocation39_spill]] %s2455_s8 }
  0x96   : > { %s2457_s25 = sld [smem:[#allocation5 + $0x5]] }
  0x97   : > { %s2459_s28 = sld [smem:[#allocation5 + $0x6]] }
  0x98   : > { %s2461_s7 = sld [smem:[#allocation5 + $0x7]] }
  0x99   : > { %s2463_s27 = sld [smem:[#allocation5 + $0x8]] }
  0x9a   : > { %s2465_s10 = sld [smem:[#allocation5 + $0x9]] }
  0x9b   : > { %s2467_s2 = sld [smem:[#allocation7]] }
  0x9c   : > { %s2469_s0 = sld [smem:[#allocation7 + $0x1]] }
  0x9d   : > { %3204 = sst [smem:[#allocation40_spill]] %s2459_s28 }
  0x9e   : > { %3205 = sst [smem:[#allocation41_spill]] %s2461_s7 }
  0x9f   : > { %3206 = sst [smem:[#allocation42_spill]] %s2463_s27 }
  0xa0   : > { %3207 = sst [smem:[#allocation43_spill]] %s2465_s10 }
  0xa1   : > { %3208 = sst [smem:[#allocation44_spill]] %s2467_s2 }
  0xa2   : > { %3209 = sst [smem:[#allocation45_spill]] %s2469_s0 }
  0xa3   : > { %s2471_s26 = sld [smem:[#allocation7 + $0x2]] }
  0xa4   : > { %s2473_s9 = sld [smem:[#allocation7 + $0x3]] }
  0xa5   : > { %s2475_s19 = sld [smem:[#allocation7 + $0x4]] }
  0xa6   : > { %s2477_s13 = sld [smem:[#allocation7 + $0x5]] }
  0xa7   : > { %s2479_s22 = sld [smem:[#allocation7 + $0x6]] }
  0xa8   : > { %s2481_s28 = sld [smem:[#allocation7 + $0x7]] }
  0xa9   : > { %3210 = sst [smem:[#allocation46_spill]] %s2471_s26 }
  0xaa   : > { %3211 = sst [smem:[#allocation47_spill]] %s2473_s9 }
  0xab   : > { %3212 = sst [smem:[#allocation48_spill]] %s2475_s19 }
  0xac   : > { %3213 = sst [smem:[#allocation49_spill]] %s2477_s13 }
  0xad   : > { %3214 = sst [smem:[#allocation50_spill]] %s2479_s22 }
  0xae   : > { %3215 = sst [smem:[#allocation51_spill]] %s2481_s28 }
  0xaf   : > { %s2483_s7 = sld [smem:[#allocation7 + $0x8]] }
  0xb0   : > { %s2485_s27 = sld [smem:[#allocation7 + $0x9]] }
  0xb1   : > { %s2487_s10 = sld [smem:[#allocation7 + $0x80]] }
  0xb2   : > { %s2489_s2 = sld [smem:[#allocation7 + $0x81]] }
  0xb3   : > { %s2491_s0 = sld [smem:[#allocation7 + $0x82]] }
  0xb4   : > { %s2493_s26 = sld [smem:[#allocation7 + $0x83]] }
  0xb5   : > { %3216 = sst [smem:[#allocation52_spill]] %s2483_s7 }
  0xb6   : > { %3217 = sst [smem:[#allocation53_spill]] %s2485_s27 }
  0xb7   : > { %3218 = sst [smem:[#allocation54_spill]] %s2487_s10 }
  0xb8   : > { %3219 = sst [smem:[#allocation55_spill]] %s2489_s2 }
  0xb9   : > { %3220 = sst [smem:[#allocation56_spill]] %s2491_s0 }
  0xba   : > { %3221 = sst [smem:[#allocation57_spill]] %s2493_s26 }
  0xbb   : > { %s2495_s9 = sld [smem:[#allocation7 + $0x84]] }
  0xbc   : > { %s2497_s19 = sld [smem:[#allocation7 + $0x85]] }
  0xbd   : > { %s2499_s13 = sld [smem:[#allocation7 + $0x86]] }
  0xbe   : > { %s2501_s22 = sld [smem:[#allocation7 + $0x87]] }
  0xbf   : > { %s2503_s28 = sld [smem:[#allocation7 + $0x88]] }
  0xc0   : > { %s2505_s7 = sld [smem:[#allocation7 + $0x89]] }
  0xc1   : > { %3222 = sst [smem:[#allocation58_spill]] %s2495_s9 }
  0xc2   : > { %3223 = sst [smem:[#allocation59_spill]] %s2497_s19 }
  0xc3   : > { %3224 = sst [smem:[#allocation60_spill]] %s2499_s13 }
  0xc4   : > { %3225 = sst [smem:[#allocation61_spill]] %s2501_s22 }
  0xc5   : > { %3226 = sst [smem:[#allocation62_spill]] %s2503_s28 }
  0xc6   : > { %3227 = sst [smem:[#allocation63_spill]] %s2505_s7 }
  0xc7   : > { %s2507_s27 = sld [smem:[#allocation7 + $0x100]] }
  0xc8   : > { %s2509_s10 = sld [smem:[#allocation7 + $0x101]] }
  0xc9   : > { %s2511_s2 = sld [smem:[#allocation7 + $0x102]] }
  0xca   : > { %s2513_s0 = sld [smem:[#allocation7 + $0x103]] }
  0xcb   : > { %s2515_s26 = sld [smem:[#allocation7 + $0x104]] }
  0xcc   : > { %s2517_s9 = sld [smem:[#allocation7 + $0x105]] }
  0xcd   : > { %3228 = sst [smem:[#allocation64_spill]] %s2507_s27 }
  0xce   : > { %3229 = sst [smem:[#allocation65_spill]] %s2509_s10 }
  0xcf   : > { %3230 = sst [smem:[#allocation66_spill]] %s2511_s2 }
  0xd0   : > { %3231 = sst [smem:[#allocation67_spill]] %s2513_s0 }
  0xd1   : > { %3232 = sst [smem:[#allocation68_spill]] %s2515_s26 }
  0xd2   : > { %3233 = sst [smem:[#allocation69_spill]] %s2517_s9 }
  0xd3   : > { %s2519_s19 = sld [smem:[#allocation7 + $0x106]] }
  0xd4   : > { %s2521_s13 = sld [smem:[#allocation7 + $0x107]] }
  0xd5   : > { %s2523_s22 = sld [smem:[#allocation7 + $0x108]] }
  0xd6   : > { %s2525_s28 = sld [smem:[#allocation7 + $0x109]] }
  0xd7   : > { %s2527_s7 = sld [smem:[#allocation7 + $0x180]] }
  0xd8   : > { %s2529_s27 = sld [smem:[#allocation7 + $0x181]] }
  0xd9   : > { %3234 = sst [smem:[#allocation70_spill]] %s2519_s19 }
  0xda   : > { %3235 = sst [smem:[#allocation71_spill]] %s2521_s13 }
  0xdb   : > { %3236 = sst [smem:[#allocation72_spill]] %s2523_s22 }
  0xdc   : > { %3237 = sst [smem:[#allocation73_spill]] %s2525_s28 }
  0xdd   : > { %3238 = sst [smem:[#allocation74_spill]] %s2527_s7 }
  0xde   : > { %3239 = sst [smem:[#allocation75_spill]] %s2529_s27 }
  0xdf   : > { %s2531_s10 = sld [smem:[#allocation7 + $0x182]] }
  0xe0   : > { %s2533_s2 = sld [smem:[#allocation7 + $0x183]] }
  0xe1   : > { %s2535_s0 = sld [smem:[#allocation7 + $0x184]] }
  0xe2   : > { %s2537_s26 = sld [smem:[#allocation7 + $0x185]] }
  0xe3   : > { %s2539_s9 = sld [smem:[#allocation7 + $0x186]] }
  0xe4   : > { %s2541_s19 = sld [smem:[#allocation7 + $0x187]] }
  0xe5   : > { %3240 = sst [smem:[#allocation76_spill]] %s2531_s10 }
  0xe6   : > { %3241 = sst [smem:[#allocation77_spill]] %s2533_s2 }
  0xe7   : > { %3242 = sst [smem:[#allocation78_spill]] %s2535_s0 }
  0xe8   : > { %3243 = sst [smem:[#allocation79_spill]] %s2537_s26 }
  0xe9   : > { %3244 = sst [smem:[#allocation80_spill]] %s2539_s9 }
  0xea   : > { %3245 = sst [smem:[#allocation81_spill]] %s2541_s19 }
  0xeb   : > { %s2543_s13 = sld [smem:[#allocation7 + $0x188]] }
  0xec   : > { %s2545_s22 = sld [smem:[#allocation7 + $0x189]] }
  0xed   : > { %s2547_s28 = sld [smem:[#allocation7 + $0x200]] }
  0xee   : > { %s2549_s7 = sld [smem:[#allocation7 + $0x201]] }
  0xef   : > { %s2551_s27 = sld [smem:[#allocation7 + $0x202]] }
  0xf0   : > { %s2553_s10 = sld [smem:[#allocation7 + $0x203]] }
  0xf1   : > { %3246 = sst [smem:[#allocation82_spill]] %s2543_s13 }
  0xf2   : > { %3247 = sst [smem:[#allocation83_spill]] %s2545_s22 }
  0xf3   : > { %3248 = sst [smem:[#allocation84_spill]] %s2547_s28 }
  0xf4   : > { %3249 = sst [smem:[#allocation85_spill]] %s2549_s7 }
  0xf5   : > { %3250 = sst [smem:[#allocation86_spill]] %s2551_s27 }
  0xf6   : > { %3251 = sst [smem:[#allocation87_spill]] %s2553_s10 }
  0xf7   : > { %s2555_s2 = sld [smem:[#allocation7 + $0x204]] }
  0xf8   : > { %s2557_s0 = sld [smem:[#allocation7 + $0x205]] }
  0xf9   : > { %s2559_s26 = sld [smem:[#allocation7 + $0x206]] }
  0xfa   : > { %s2561_s9 = sld [smem:[#allocation7 + $0x207]] }
  0xfb   : > { %s2563_s19 = sld [smem:[#allocation7 + $0x208]] }
  0xfc   : > { %s2565_s13 = sld [smem:[#allocation7 + $0x209]] }
  0xfd   : > { %3252 = sst [smem:[#allocation88_spill]] %s2555_s2 }
  0xfe   : > { %3253 = sst [smem:[#allocation89_spill]] %s2557_s0 }
  0xff   : > { %3254 = sst [smem:[#allocation90_spill]] %s2559_s26 }
 0x100   : > { %3255 = sst [smem:[#allocation91_spill]] %s2561_s9 }
 0x101   : > { %3256 = sst [smem:[#allocation92_spill]] %s2563_s19 }
 0x102   : > { %3257 = sst [smem:[#allocation93_spill]] %s2565_s13 }
 0x103   : > { %s2567_s22 = sld [smem:[#allocation7 + $0x280]] }
 0x104   : > { %s2569_s28 = sld [smem:[#allocation7 + $0x281]] }
 0x105   : > { %s2571_s7 = sld [smem:[#allocation7 + $0x282]] }
 0x106   : > { %s2573_s27 = sld [smem:[#allocation7 + $0x283]] }
 0x107   : > { %s2575_s10 = sld [smem:[#allocation7 + $0x284]] }
 0x108   : > { %s2577_s2 = sld [smem:[#allocation7 + $0x285]] }
 0x109   : > { %3258 = sst [smem:[#allocation94_spill]] %s2567_s22 }
 0x10a   : > { %3259 = sst [smem:[#allocation95_spill]] %s2569_s28 }
 0x10b   : > { %3260 = sst [smem:[#allocation96_spill]] %s2571_s7 }
 0x10c   : > { %3261 = sst [smem:[#allocation97_spill]] %s2573_s27 }
 0x10d   : > { %3262 = sst [smem:[#allocation98_spill]] %s2575_s10 }
 0x10e   : > { %3263 = sst [smem:[#allocation99_spill]] %s2577_s2 }
 0x10f   : > { %s2579_s0 = sld [smem:[#allocation7 + $0x286]] }
 0x110   : > { %s2581_s26 = sld [smem:[#allocation7 + $0x287]] }
 0x111   : > { %s2583_s9 = sld [smem:[#allocation7 + $0x288]] }
 0x112   : > { %s2585_s19 = sld [smem:[#allocation7 + $0x289]] }
 0x113   : > { %s2587_s13 = sld [smem:[#allocation7 + $0x300]] }
 0x114   : > { %s2589_s22 = sld [smem:[#allocation7 + $0x301]] }
 0x115   : > { %3264 = sst [smem:[#allocation100_spill]] %s2579_s0 }
 0x116   : > { %3265 = sst [smem:[#allocation101_spill]] %s2581_s26 }
 0x117   : > { %3266 = sst [smem:[#allocation102_spill]] %s2583_s9 }
 0x118   : > { %3267 = sst [smem:[#allocation103_spill]] %s2585_s19 }
 0x119   : > { %3268 = sst [smem:[#allocation104_spill]] %s2587_s13 }
 0x11a   : > { %3269 = sst [smem:[#allocation105_spill]] %s2589_s22 }
 0x11b   : > { %s2591_s28 = sld [smem:[#allocation7 + $0x302]] }
 0x11c   : > { %s2593_s7 = sld [smem:[#allocation7 + $0x303]] }
 0x11d   : > { %s2595_s27 = sld [smem:[#allocation7 + $0x304]] }
 0x11e   : > { %s2597_s10 = sld [smem:[#allocation7 + $0x305]] }
 0x11f   : > { %s2599_s2 = sld [smem:[#allocation7 + $0x306]] }
 0x120   : > { %s2601_s0 = sld [smem:[#allocation7 + $0x307]] }
 0x121   : > { %3270 = sst [smem:[#allocation106_spill]] %s2591_s28 }
 0x122   : > { %3271 = sst [smem:[#allocation107_spill]] %s2593_s7 }
 0x123   : > { %3272 = sst [smem:[#allocation108_spill]] %s2595_s27 }
 0x124   : > { %3273 = sst [smem:[#allocation109_spill]] %s2597_s10 }
 0x125   : > { %3274 = sst [smem:[#allocation110_spill]] %s2599_s2 }
 0x126   : > { %3275 = sst [smem:[#allocation111_spill]] %s2601_s0 }
 0x127   : > { %s2603_s26 = sld [smem:[#allocation7 + $0x308]] }
 0x128   : > { %s2605_s9 = sld [smem:[#allocation7 + $0x309]] }
 0x129   : > { %s2607_s19 = sld [smem:[#allocation7 + $0x380]] }
 0x12a   : > { %s2609_s13 = sld [smem:[#allocation7 + $0x381]] }
 0x12b   : > { %s2611_s22 = sld [smem:[#allocation7 + $0x382]] }
 0x12c   : > { %s2613_s28 = sld [smem:[#allocation7 + $0x383]] }
 0x12d   : > { %3276 = sst [smem:[#allocation112_spill]] %s2603_s26 }
 0x12e   : > { %3277 = sst [smem:[#allocation113_spill]] %s2605_s9 }
 0x12f   : > { %3278 = sst [smem:[#allocation114_spill]] %s2607_s19 }
 0x130   : > { %3279 = sst [smem:[#allocation115_spill]] %s2609_s13 }
 0x131   : > { %3280 = sst [smem:[#allocation116_spill]] %s2611_s22 }
 0x132   : > { %3281 = sst [smem:[#allocation117_spill]] %s2613_s28 }
 0x133   : > { %s2615_s7 = sld [smem:[#allocation7 + $0x384]] }
 0x134   : > { %s2617_s27 = sld [smem:[#allocation7 + $0x385]] }
 0x135   : > { %s2619_s10 = sld [smem:[#allocation7 + $0x386]] }
 0x136   : > { %s2621_s2 = sld [smem:[#allocation7 + $0x387]] }
 0x137   : > { %s2623_s0 = sld [smem:[#allocation7 + $0x388]] }
 0x138   : > { %s2625_s26 = sld [smem:[#allocation7 + $0x389]] }
 0x139   : > { %3282 = sst [smem:[#allocation118_spill]] %s2615_s7 }
 0x13a   : > { %3283 = sst [smem:[#allocation119_spill]] %s2617_s27 }
 0x13b   : > { %3284 = sst [smem:[#allocation120_spill]] %s2619_s10 }
 0x13c   : > { %3285 = sst [smem:[#allocation121_spill]] %s2621_s2 }
 0x13d   : > { %3286 = sst [smem:[#allocation122_spill]] %s2623_s0 }
 0x13e   : > { %3287 = sst [smem:[#allocation123_spill]] %s2625_s26 }
 0x13f   : > { %s2627_s9 = sld [smem:[#allocation7 + $0x400]] }
 0x140   : > { %s2629_s19 = sld [smem:[#allocation7 + $0x401]] }
 0x141   : > { %s2631_s13 = sld [smem:[#allocation7 + $0x402]] }
 0x142   : > { %s2633_s22 = sld [smem:[#allocation7 + $0x403]] }
 0x143   : > { %s2635_s28 = sld [smem:[#allocation7 + $0x404]] }
 0x144   : > { %s2637_s7 = sld [smem:[#allocation7 + $0x405]] }
 0x145   : > { %3288 = sst [smem:[#allocation124_spill]] %s2627_s9 }
 0x146   : > { %3289 = sst [smem:[#allocation125_spill]] %s2629_s19 }
 0x147   : > { %3290 = sst [smem:[#allocation126_spill]] %s2631_s13 }
 0x148   : > { %3291 = sst [smem:[#allocation127_spill]] %s2633_s22 }
 0x149   : > { %3292 = sst [smem:[#allocation128_spill]] %s2635_s28 }
 0x14a   : > { %3293 = sst [smem:[#allocation129_spill]] %s2637_s7 }
 0x14b   : > { %s2639_s27 = sld [smem:[#allocation7 + $0x406]] }
 0x14c   : > { %s2641_s10 = sld [smem:[#allocation7 + $0x407]] }
 0x14d   : > { %s2643_s2 = sld [smem:[#allocation7 + $0x408]] }
 0x14e   : > { %s2645_s0 = sld [smem:[#allocation7 + $0x409]] }
 0x14f   : > { %s2647_s26 = sld [smem:[#allocation7 + $0x480]] }
 0x150   : > { %s2649_s9 = sld [smem:[#allocation7 + $0x481]] }
 0x151   : > { %3294 = sst [smem:[#allocation130_spill]] %s2639_s27 }
 0x152   : > { %3295 = sst [smem:[#allocation131_spill]] %s2641_s10 }
 0x153   : > { %3296 = sst [smem:[#allocation132_spill]] %s2643_s2 }
 0x154   : > { %3297 = sst [smem:[#allocation133_spill]] %s2645_s0 }
 0x155   : > { %3298 = sst [smem:[#allocation134_spill]] %s2647_s26 }
 0x156   : > { %3299 = sst [smem:[#allocation135_spill]] %s2649_s9 }
 0x157   : > { %s2651_s19 = sld [smem:[#allocation7 + $0x482]] }
 0x158   : > { %s2653_s13 = sld [smem:[#allocation7 + $0x483]] }
 0x159   : > { %s2655_s22 = sld [smem:[#allocation7 + $0x484]] }
 0x15a   : > { %s2657_s28 = sld [smem:[#allocation7 + $0x485]] }
 0x15b   : > { %s2659_s7 = sld [smem:[#allocation7 + $0x486]] }
 0x15c   : > { %s2661_s27 = sld [smem:[#allocation7 + $0x487]] }
 0x15d   : > { %3300 = sst [smem:[#allocation136_spill]] %s2651_s19 }
 0x15e   : > { %3301 = sst [smem:[#allocation137_spill]] %s2653_s13 }
 0x15f   : > { %3302 = sst [smem:[#allocation138_spill]] %s2655_s22 }
 0x160   : > { %3303 = sst [smem:[#allocation139_spill]] %s2657_s28 }
 0x161   : > { %3304 = sst [smem:[#allocation140_spill]] %s2659_s7 }
 0x162   : > { %3305 = sst [smem:[#allocation141_spill]] %s2661_s27 }
 0x163   : > { %s2663_s10 = sld [smem:[#allocation7 + $0x488]] }
 0x164   : > { %s2665_s2 = sld [smem:[#allocation7 + $0x489]] }
 0x165   : > { %s2667_s0 = sld [smem:[#allocation8]] }
 0x166   : > { %s2669_s26 = sld [smem:[#allocation8 + $0x1]] }
 0x167   : > { %s2671_s9 = sld [smem:[#allocation8 + $0x2]] }
 0x168   : > { %s2673_s19 = sld [smem:[#allocation8 + $0x3]] }
 0x169   : > { %3306 = sst [smem:[#allocation142_spill]] %s2663_s10 }
 0x16a   : > { %3307 = sst [smem:[#allocation143_spill]] %s2665_s2 }
 0x16b   : > { %3308 = sst [smem:[#allocation144_spill]] %s2667_s0 }
 0x16c   : > { %3309 = sst [smem:[#allocation145_spill]] %s2669_s26 }
 0x16d   : > { %3310 = sst [smem:[#allocation146_spill]] %s2671_s9 }
 0x16e   : > { %3311 = sst [smem:[#allocation147_spill]] %s2673_s19 }
 0x16f   : > { %s2675_s13 = sld [smem:[#allocation8 + $0x4]] }
 0x170   : > { %s2677_s22 = sld [smem:[#allocation8 + $0x5]] }
 0x171   : > { %s2679_s28 = sld [smem:[#allocation8 + $0x6]] }
 0x172   : > { %s2681_s7 = sld [smem:[#allocation8 + $0x7]] }
 0x173   : > { %s2683_s27 = sld [smem:[#allocation8 + $0x8]] }
 0x174   : > { %s2685_s10 = sld [smem:[#allocation8 + $0x9]] }
 0x175   : > { %3312 = sst [smem:[#allocation148_spill]] %s2675_s13 }
 0x176   : > { %3313 = sst [smem:[#allocation149_spill]] %s2677_s22 }
 0x177   : > { %3314 = sst [smem:[#allocation150_spill]] %s2679_s28 }
 0x178   : > { %3315 = sst [smem:[#allocation151_spill]] %s2681_s7 }
 0x179   : > { %3316 = sst [smem:[#allocation152_spill]] %s2683_s27 }
 0x17a   : > { %3317 = sst [smem:[#allocation153_spill]] %s2685_s10 }
 0x17b   : > { %s2687_s2 = sld [smem:[#allocation10]] }
 0x17c   : > { %s2689_s0 = sld [smem:[#allocation10 + $0x1]] }
 0x17d   : > { %s2691_s26 = sld [smem:[#allocation10 + $0x2]] }
 0x17e   : > { %s2693_s9 = sld [smem:[#allocation10 + $0x3]] }
 0x17f   : > { %s2695_s19 = sld [smem:[#allocation10 + $0x4]] }
 0x180   : > { %s2697_s13 = sld [smem:[#allocation10 + $0x5]] }
 0x181   : > { %3318 = sst [smem:[#allocation154_spill]] %s2687_s2 }
 0x182   : > { %3319 = sst [smem:[#allocation155_spill]] %s2689_s0 }
 0x183   : > { %3320 = sst [smem:[#allocation156_spill]] %s2691_s26 }
 0x184   : > { %3321 = sst [smem:[#allocation157_spill]] %s2693_s9 }
 0x185   : > { %3322 = sst [smem:[#allocation158_spill]] %s2695_s19 }
 0x186   : > { %3323 = sst [smem:[#allocation159_spill]] %s2697_s13 }
 0x187   : > { %s2699_s22 = sld [smem:[#allocation10 + $0x6]] }
 0x188   : > { %s2701_s7 = sld [smem:[#allocation10 + $0x7]] }
 0x189   : > { %s2703_s27 = sld [smem:[#allocation10 + $0x8]] }
 0x18a   : > { %s2705_s10 = sld [smem:[#allocation10 + $0x9]] }
 0x18b   : > { %s2707_s2 = sld [smem:[#allocation10 + $0x80]] }
 0x18c   : > { %s2709_s0 = sld [smem:[#allocation10 + $0x81]] }
 0x18d   : > { %3324 = sst [smem:[#allocation160_spill]] %s2699_s22 }
 0x18e   : > { %3325 = sst [smem:[#allocation161_spill]] %s2701_s7 }
 0x18f   : > { %3326 = sst [smem:[#allocation162_spill]] %s2703_s27 }
 0x190   : > { %3327 = sst [smem:[#allocation163_spill]] %s2705_s10 }
 0x191   : > { %3328 = sst [smem:[#allocation164_spill]] %s2707_s2 }
 0x192   : > { %3329 = sst [smem:[#allocation165_spill]] %s2709_s0  ;;  %s2732_s0 = scalar_lea.vmem [#allocation13], %s2388_s14  }
 0x193   : > { %s2711_s26 = sld [smem:[#allocation10 + $0x82]] }
 0x194   : > { %s2713_s9 = sld [smem:[#allocation10 + $0x83]] }
 0x195   : > { %s2715_s19 = sld [smem:[#allocation10 + $0x84]] }
 0x196   : > { %s2717_s13 = sld [smem:[#allocation10 + $0x85]] }
 0x197   : > { %s2719_s22 = sld [smem:[#allocation10 + $0x86]] }
 0x198   : > { %s2721_s28 = sld [smem:[#allocation10 + $0x87]] }
 0x199   : > { %3330 = sst [smem:[#allocation166_spill]] %s2711_s26  ;;  %s2734_s26 = smov 0  }
 0x19a   : > { %s2723_s7 = sld [smem:[#allocation10 + $0x88]] }
 0x19b   : > { %s2725_s27 = sld [smem:[#allocation10 + $0x89]] }
 0x19c   : > { %s2727_s10 = sld [smem:[#allocation11]] }
 0x19d   : > { %s2729_s2 = sld [smem:[#allocation11 + $0x1]] }
 0x19e   : > { %3333 = sst [smem:[#allocation169_spill]] %s2732_s0 }
 0x1a1   : > { %3331 = sst [smem:[#allocation167_spill]] %s2725_s27 }
 0x1a3   : > { %3332 = sst [smem:[#allocation168_spill]] %s2729_s2 }
 0x1a4 LB: >> { %s3334_s11 = sld [smem:[#allocation24_spill]]  ;;  %v664_v6 = vstv %s2407_s24  ;;  %v672_v9 = vstv %s2411_s17  ;;  %v674_v10 = vstv %s2413_s23  ;;  %v680_v12 = vstv %s2415_s29  ;;  %s3158_s2 = sshll.u32 %s2165_s26, 3  ;;  %s2165_s26 = sphi %s2734_s26, %s657_s26  }
 0x1a5   : >> { %s3335_s3 = sld [smem:[#allocation35_spill]]  ;;  %v682_v13 = vstv %s2417_s30  ;;  %v690_v16 = vstv %s2421_s21  ;;  %v704_v21 = vstv %s2427_s16  ;;  %v706_v24 = vstv %s2429_s18 }
 0x1a6   : >> { %s3336_s4 = sld [smem:[#allocation36_spill]]  ;;  %v709_v25 = vstv %s2457_s25  ;;  %v712_v45 = vstv %s2431_s20 }
 0x1a7   : >> { %s3337_s5 = sld [smem:[#allocation37_spill]] }
 0x1a8   : >> { %s3338_s1 = sld [smem:[#allocation25_spill]] }
 0x1a9   : >> { %s3339_s6 = sld [smem:[#allocation38_spill]] }
 0x1aa   : >> { %s3340_s14 = sld [smem:[#allocation23_spill]]  ;;  %v666_v7 = vstv %s3334_s11 }
 0x1ab   : >> { %s3341_s12 = sld [smem:[#allocation26_spill]]  ;;  %v669_v8 = vstv %s3335_s3 }
 0x1ac   : >> { %s3342_s15 = sld [smem:[#allocation27_spill]]  ;;  %v677_v11 = vstv %s3336_s4 }
 0x1ad   : >> { %s3343_s8 = sld [smem:[#allocation39_spill]]  ;;  %v685_v14 = vstv %s3337_s5 }
 0x1ae   : >> { %v688_v15 = vstv %s3338_s1  ;;  %s3348_s1 = sld [smem:[#allocation30_spill]] }
 0x1af   : >> { %v693_v17 = vstv %s3339_s6  ;;  %s3349_s3 = sld [smem:[#allocation41_spill]] }
 0x1b0   : >> { %s3344_s0 = scalar_lea.vmem [#allocation2], %s3340_s14  ;;  %s3350_s4 = sld [smem:[#allocation31_spill]] }
 0x1b1   : >> { %s659_s27 = scalar_lea.vmem %s3344_s0, %s3158_s2 [#allocation2]  ;;  %v696_v18 = vstv %s3341_s12  ;;  %s3345_s0 = sld [smem:[#allocation28_spill]] }
 0x1b2   : >> { %v698_v19 = vstv %s3342_s15  ;;  %v660_v22 = vld [vmem:[%s659_s27] sm:$0xff]  ;;  %v1684_v23 = vld [vmem:[%s659_s27 + $0x10] sm:$0xff]  ;;  %s3346_s27 = sld [smem:[#allocation40_spill]] }
 0x1b3   : >> { %v701_v20 = vstv %s3343_s8  ;;  %v665_v26 = vmul.f32 %v664_v6, %v660_v22  ;;  %v667_v27 = vmul.f32 %v1684_v23, %v666_v7  ;;  %v673_v28 = vmul.f32 %v672_v9, %v660_v22  ;;  %s3347_s2 = sld [smem:[#allocation29_spill]] }
 0x1b4   : >> { %v675_v29 = vmul.f32 %v1684_v23, %v674_v10  ;;  %v681_v30 = vmul.f32 %v680_v12, %v660_v22  ;;  %v683_v31 = vmul.f32 %v1684_v23, %v682_v13  ;;  %v689_v32 = vmul.f32 %v688_v15, %v660_v22  ;;  %s3351_s5 = sld [smem:[#allocation32_spill]] }
 0x1b5   : >> { %v691_v33 = vmul.f32 %v1684_v23, %v690_v16  ;;  %v668_v34 = vadd.f32 %v667_v27, %v665_v26  ;;  %v697_v36 = vmul.f32 %v696_v18, %v660_v22  ;;  %v699_v37 = vmul.f32 %v1684_v23, %v698_v19  ;;  %s3352_s6 = sld [smem:[#allocation42_spill]] }
 0x1b6   : >> { %v676_v35 = vadd.f32 %v675_v29, %v673_v28  ;;  %v684_v38 = vadd.f32 %v683_v31, %v681_v30  ;;  %v705_v40 = vmul.f32 %v704_v21, %v660_v22  ;;  %v707_v41 = vmul.f32 %v1684_v23, %v706_v24  ;;  %s3353_s8 = sld [smem:[#allocation33_spill]] }
 0x1b7   : >> { %v692_v39 = vadd.f32 %v691_v33, %v689_v32  ;;  %v670_v42 = vadd.f32 %v669_v8, %v668_v34  ;;  %v700_v44 = vadd.f32 %v699_v37, %v697_v36  ;;  %v713_v49 = vmul.f32 %v712_v45, %v660_v22  ;;  %s3354_s11 = sld [smem:[#allocation34_spill]] }
 0x1b8   : >> { %v678_v43 = vadd.f32 %v677_v11, %v676_v35  ;;  %v686_v46 = vadd.f32 %v685_v14, %v684_v38  ;;  %v708_v48 = vadd.f32 %v707_v41, %v705_v40  ;;  %v714_v52 = vstv %s3345_s0  ;;  %s3355_s12 = sld [smem:[#allocation44_spill]] }
 0x1b9   : >> { %v694_v47 = vadd.f32 %v693_v17, %v692_v39  ;;  %v2763_v50 = vmax.f32 %v670_v42, 0.0  ;;  %v702_v51 = vadd.f32 %v701_v20, %v700_v44  ;;  %v715_v56 = vmul.f32 %v1684_v23, %v714_v52  ;;  %s3356_s0 = sld [smem:[#allocation43_spill]] }
 0x1ba   : >> { %v2766_v53 = vmax.f32 %v678_v43, 0.0  ;;  %v2768_v54 = vmax.f32 %v686_v46, 0.0  ;;  %v710_v55 = vadd.f32 %v709_v25, %v708_v48  ;;  %v717_v58 = vstv %s3346_s27  ;;  %s3357_s14 = sld [smem:[#allocation45_spill]] }
 0x1bb   : >> { %v2770_v57 = vmax.f32 %v694_v47, 0.0  ;;  %v720_v59 = vstv %s3347_s2  ;;  %v722_v60 = vstv %s3348_s1  ;;  %v2775_v61 = vmax.f32 %v702_v51, 0.0  ;;  %s3358_s15 = sld [smem:[#allocation46_spill]] }
 0x1bc   : >> { %v716_v62 = vadd.f32 %v715_v56, %v713_v49  ;;  %v721_v63 = vmul.f32 %v720_v59, %v660_v22  ;;  %v723_v0 = vmul.f32 %v1684_v23, %v722_v60  ;;  %v2777_v1 = vmax.f32 %v710_v55, 0.0  ;;  %s3359_s2 = sld [smem:[#allocation47_spill]] }
 0x1bd   : >> { %v725_v2 = vstv %s3349_s3  ;;  %v728_v3 = vstv %s3350_s4  ;;  %v730_v4 = vstv %s3351_s5  ;;  %v733_v9 = vstv %s3352_s6  ;;  %s3360_s1 = sld [smem:[#allocation48_spill]] }
 0x1be   : >> { %v718_v5 = vadd.f32 %v717_v58, %v716_v62  ;;  %v724_v6 = vadd.f32 %v723_v0, %v721_v63  ;;  %v729_v7 = vmul.f32 %v728_v3, %v660_v22  ;;  %v731_v8 = vmul.f32 %v1684_v23, %v730_v4  ;;  %s3361_s27 = sld [smem:[#allocation49_spill]] }
 0x1bf   : >> { %v736_v10 = vstv %s3353_s8  ;;  %v738_v11 = vstv %s3354_s11  ;;  %v744_v12 = vstv %s3355_s12  ;;  %v741_v16 = vstv %s3356_s0  ;;  %s3362_s3 = sld [smem:[#allocation50_spill]] }
 0x1c0   : >> { %v726_v13 = vadd.f32 %v725_v2, %v724_v6  ;;  %v732_v14 = vadd.f32 %v731_v8, %v729_v7  ;;  %v737_v15 = vmul.f32 %v736_v10, %v660_v22  ;;  %v739_v17 = vmul.f32 %v1684_v23, %v738_v11  ;;  %s3363_s4 = sld [smem:[#allocation51_spill]] }
 0x1c1   : >> { %v745_v18 = vmul.f32 %v744_v12, %v2763_v50  ;;  %v746_v19 = vstv %s3357_s14  ;;  %v749_v20 = vstv %s3358_s15  ;;  %v2790_v21 = vmax.f32 %v718_v5, 0.0  ;;  %s3364_s5 = sld [smem:[#allocation52_spill]] }
 0x1c2   : >> { %v734_v24 = vadd.f32 %v733_v9, %v732_v14  ;;  %v747_v25 = vmul.f32 %v746_v19, %v2766_v53  ;;  %v750_v26 = vmul.f32 %v749_v20, %v2768_v54  ;;  %v740_v27 = vadd.f32 %v739_v17, %v737_v15  ;;  %s3365_s6 = sld [smem:[#allocation54_spill]] }
 0x1c3   : >> { %v752_v28 = vstv %s3359_s2  ;;  %v755_v29 = vstv %s3360_s1  ;;  %s3366_s8 = sld [smem:[#allocation55_spill]]  ;;  %v2798_v31 = vmax.f32 %v726_v13, 0.0 }
 0x1c4   : >> { %v758_v22 = vstv %s3361_s27  ;;  %v748_v23 = vadd.f32 %v747_v25, %v745_v18  ;;  %s3367_s11 = sld [smem:[#allocation56_spill]]  ;;  %v753_v30 = vmul.f32 %v752_v28, %v2770_v57  ;;  %v742_v32 = vadd.f32 %v741_v16, %v740_v27 }
 0x1c5   : >> { %s3368_s14 = sld [smem:[#allocation53_spill]]  ;;  %v761_v33 = vstv %s3362_s3  ;;  %v2801_v34 = vmax.f32 %v734_v24, 0.0  ;;  %v756_v36 = vmul.f32 %v755_v29, %v2775_v61  ;;  %v759_v37 = vmul.f32 %v758_v22, %v2777_v1 }
 0x1c6   : >> { %v751_v35 = vadd.f32 %v750_v26, %v748_v23  ;;  %s3369_s12 = sld [smem:[#allocation57_spill]]  ;;  %v2805_v38 = vmax.f32 %v742_v32, 0.0  ;;  %v762_v39 = vmul.f32 %v761_v33, %v2790_v21  ;;  %v764_v40 = vstv %s3363_s4 }
 0x1c7   : >> { %s3370_s15 = sld [smem:[#allocation58_spill]]  ;;  %v767_v41 = vstv %s3364_s5  ;;  %v765_v58 = vmul.f32 %v764_v40, %v2798_v31 }
 0x1c8   : >> { %s3371_s0 = sld [smem:[#allocation59_spill]]  ;;  %v754_v42 = vadd.f32 %v753_v30, %v751_v35  ;;  %v776_v43 = vstv %s3365_s6  ;;  %v768_v59 = vmul.f32 %v767_v41, %v2801_v34 }
 0x1c9   : >> { %s3372_s2 = sld [smem:[#allocation144_spill]]  ;;  %v778_v44 = vstv %s3366_s8  ;;  %v777_v47 = vmul.f32 %v776_v43, %v2763_v50 }
 0x1ca   : >> { %s3373_s1 = sld [smem:[#allocation60_spill]]  ;;  %v781_v45 = vstv %s3367_s11  ;;  %v779_v48 = vmul.f32 %v778_v44, %v2766_v53  ;;  %v757_v51 = vadd.f32 %v756_v36, %v754_v42 }
 0x1cb   : >> { %s3374_s27 = sld [smem:[#allocation61_spill]]  ;;  %v770_v46 = vstv %s3368_s14  ;;  %v782_v49 = vmul.f32 %v781_v45, %v2768_v54 }
 0x1cc   : >> { %v784_v52 = vstv %s3369_s12  ;;  %s3375_s3 = sld [smem:[#allocation62_spill]]  ;;  %v780_v60 = vadd.f32 %v779_v48, %v777_v47  ;;  %v760_v63 = vadd.f32 %v759_v37, %v757_v51  ;;  %v771_v4 = vmul.f32 %v770_v46, %v2805_v38 }
 0x1cd   : >> { %v787_v55 = vstv %s3370_s15  ;;  %s3376_s4 = sld [smem:[#allocation64_spill]]  ;;  %v785_v62 = vmul.f32 %v784_v52, %v2770_v57 }
 0x1ce   : >> { %v790_v56 = vstv %s3371_s0  ;;  %s3377_s5 = sld [smem:[#allocation65_spill]]  ;;  %v783_v5 = vadd.f32 %v782_v49, %v780_v60  ;;  %v788_v6 = vmul.f32 %v787_v55, %v2775_v61  ;;  %v763_v8 = vadd.f32 %v762_v39, %v760_v63 }
 0x1cf   : >> { %v773_v0 = vstv %s3372_s2  ;;  %s3378_s6 = sld [smem:[#allocation66_spill]]  ;;  %v791_v7 = vmul.f32 %v790_v56, %v2777_v1 }
 0x1d0   : >> { %v793_v2 = vstv %s3373_s1  ;;  %s3379_s8 = sld [smem:[#allocation67_spill]]  ;;  %v786_v12 = vadd.f32 %v785_v62, %v783_v5  ;;  %v766_v16 = vadd.f32 %v765_v58, %v763_v8 }
 0x1d1   : >> { %v796_v3 = vstv %s3374_s27  ;;  %s3380_s11 = sld [smem:[#allocation63_spill]]  ;;  %v794_v9 = vmul.f32 %v793_v2, %v2790_v21 }
 0x1d2   : >> { %s3381_s14 = sld [smem:[#allocation68_spill]]  ;;  %v799_v10 = vstv %s3375_s3  ;;  %v797_v13 = vmul.f32 %v796_v3, %v2798_v31  ;;  %v789_v20 = vadd.f32 %v788_v6, %v786_v12  ;;  %v769_v27 = vadd.f32 %v768_v59, %v766_v16 }
 0x1d3   : >> { %v808_v11 = vstv %s3376_s4  ;;  %s3382_s12 = sld [smem:[#allocation69_spill]]  ;;  %v800_v30 = vmul.f32 %v799_v10, %v2801_v34 }
 0x1d4   : >> { %v809_v14 = vmul.f32 %v808_v11, %v2763_v50  ;;  %s3383_s15 = sld [smem:[#allocation70_spill]]  ;;  %v810_v15 = vstv %s3377_s5  ;;  %v792_v23 = vadd.f32 %v791_v7, %v789_v20  ;;  %v772_v35 = vadd.f32 %v771_v4, %v769_v27 }
 0x1d5   : >> { %s3384_s0 = sld [smem:[#allocation71_spill]]  ;;  %v811_v17 = vmul.f32 %v810_v15, %v2766_v53  ;;  %v813_v18 = vstv %s3378_s6 }
 0x1d6   : >> { %s3385_s2 = sld [smem:[#allocation145_spill]]  ;;  %v816_v19 = vstv %s3379_s8  ;;  %v814_v25 = vmul.f32 %v813_v18, %v2768_v54  ;;  %v795_v40 = vadd.f32 %v794_v9, %v792_v23  ;;  %v2857_v55 = vadd.f32 %v773_v0, %v772_v35 }
 0x1d7   : >> { %v802_v24 = vstv %s3380_s11  ;;  %v812_v28 = vadd.f32 %v811_v17, %v809_v14  ;;  %v817_v29 = vmul.f32 %v816_v19, %v2770_v57  ;;  %s3386_s1 = sld [smem:[#allocation72_spill]] }
 0x1d8   : >> { %v819_v26 = vstv %s3381_s14  ;;  %s3387_s27 = sld [smem:[#allocation73_spill]]  ;;  %v803_v41 = vmul.f32 %v802_v24, %v2805_v38  ;;  %v798_v48 = vadd.f32 %v797_v13, %v795_v40  ;;  %v775_v14 = vmax.f32 %v2857_v55, 0.0 }
 0x1d9   : >> { %v822_v22 = vstv %s3382_s12  ;;  %s3388_s3 = sld [smem:[#allocation74_spill]]  ;;  %v815_v37 = vadd.f32 %v814_v25, %v812_v28  ;;  %v820_v39 = vmul.f32 %v819_v26, %v2775_v61 }
 0x1da   : >> { %v825_v32 = vstv %s3383_s15  ;;  %s3389_s4 = sld [smem:[#allocation75_spill]]  ;;  %v823_v42 = vmul.f32 %v822_v22, %v2777_v1  ;;  %v801_v60 = vadd.f32 %v800_v30, %v798_v48 }
 0x1db   : >> { %v828_v33 = vstv %s3384_s0  ;;  %s3390_s5 = sld [smem:[#allocation76_spill]]  ;;  %v826_v43 = vmul.f32 %v825_v32, %v2790_v21  ;;  %v818_v44 = vadd.f32 %v817_v29, %v815_v37 }
 0x1dc   : >> { %v805_v36 = vstv %s3385_s2  ;;  %s3391_s6 = sld [smem:[#allocation77_spill]]  ;;  %v829_v45 = vmul.f32 %v828_v33, %v2798_v31  ;;  %v804_v7 = vadd.f32 %v803_v41, %v801_v60 }
 0x1dd   : >> { %s3392_s8 = sld [smem:[#allocation78_spill]]  ;;  %v831_v46 = vstv %s3386_s1  ;;  %v821_v56 = vadd.f32 %v820_v39, %v818_v44 }
 0x1de   : >> { %s3393_s11 = sld [smem:[#allocation146_spill]]  ;;  %v834_v47 = vstv %s3387_s27  ;;  %v832_v11 = vmul.f32 %v831_v46, %v2801_v34  ;;  %v2875_v18 = vadd.f32 %v805_v36, %v804_v7 }
 0x1df   : >> { %v840_v49 = vstv %s3388_s3  ;;  %s3394_s14 = sld [smem:[#allocation79_spill]]  ;;  %v824_v3 = vadd.f32 %v823_v42, %v821_v56  ;;  %v835_v15 = vmul.f32 %v834_v47, %v2805_v38 }
 0x1e0   : >> { %v842_v51 = vstv %s3389_s4  ;;  %s3395_s12 = sld [smem:[#allocation80_spill]]  ;;  %v841_v58 = vmul.f32 %v840_v49, %v2763_v50  ;;  %v807_v46 = vmax.f32 %v2875_v18, 0.0 }
 0x1e1   : >> { %v845_v52 = vstv %s3390_s5  ;;  %s3396_s15 = sld [smem:[#allocation81_spill]]  ;;  %v843_v59 = vmul.f32 %v842_v51, %v2766_v53  ;;  %v827_v10 = vadd.f32 %v826_v43, %v824_v3 }
 0x1e2   : >> { %v846_v62 = vmul.f32 %v845_v52, %v2768_v54  ;;  %v848_v63 = vstv %s3391_s6  ;;  %s3397_s0 = sld [smem:[#allocation82_spill]] }
 0x1e3   : >> { %v851_v2 = vstv %s3392_s8  ;;  %v844_v5 = vadd.f32 %v843_v59, %v841_v58  ;;  %v849_v6 = vmul.f32 %v848_v63, %v2770_v57  ;;  %s3398_s2 = sld [smem:[#allocation83_spill]]  ;;  %v830_v19 = vadd.f32 %v829_v45, %v827_v10 }
 0x1e4   : >> { %v837_v4 = vstv %s3393_s11  ;;  %s3399_s1 = sld [smem:[#allocation84_spill]]  ;;  %v852_v13 = vmul.f32 %v851_v2, %v2775_v61 }
 0x1e5   : >> { %v854_v8 = vstv %s3394_s14  ;;  %s3400_s27 = sld [smem:[#allocation85_spill]]  ;;  %v847_v12 = vadd.f32 %v846_v62, %v844_v5  ;;  %v833_v29 = vadd.f32 %v832_v11, %v830_v19 }
 0x1e6   : >> { %v857_v0 = vstv %s3395_s12  ;;  %s3401_s3 = sld [smem:[#allocation86_spill]]  ;;  %v855_v16 = vmul.f32 %v854_v8, %v2777_v1 }
 0x1e7   : >> { %v860_v9 = vstv %s3396_s15  ;;  %s3402_s4 = sld [smem:[#allocation87_spill]]  ;;  %v858_v17 = vmul.f32 %v857_v0, %v2790_v21  ;;  %v850_v20 = vadd.f32 %v849_v6, %v847_v12  ;;  %v836_v37 = vadd.f32 %v835_v15, %v833_v29 }
 0x1e8   : >> { %s3403_s5 = sld [smem:[#allocation88_spill]]  ;;  %v861_v24 = vmul.f32 %v860_v9, %v2798_v31  ;;  %v863_v25 = vstv %s3397_s0 }
 0x1e9   : >> { %s3404_s6 = sld [smem:[#allocation89_spill]]  ;;  %v866_v26 = vstv %s3398_s2  ;;  %v853_v22 = vadd.f32 %v852_v13, %v850_v20  ;;  %v864_v42 = vmul.f32 %v863_v25, %v2801_v34  ;;  %v2895_v51 = vadd.f32 %v837_v4, %v836_v37 }
 0x1ea   : >> { %v872_v27 = vstv %s3399_s1  ;;  %s3405_s8 = sld [smem:[#allocation90_spill]]  ;;  %v867_v43 = vmul.f32 %v866_v26, %v2805_v38 }
 0x1eb   : >> { %v874_v28 = vstv %s3400_s27  ;;  %v873_v23 = vmul.f32 %v872_v27, %v2763_v50  ;;  %s3406_s11 = sld [smem:[#allocation147_spill]]  ;;  %v856_v39 = vadd.f32 %v855_v16, %v853_v22  ;;  %v839_v19 = vmax.f32 %v2895_v51, 0.0 }
 0x1ec   : >> { %v875_v30 = vmul.f32 %v874_v28, %v2766_v53  ;;  %v877_v32 = vstv %s3401_s3  ;;  %s3407_s14 = sld [smem:[#allocation91_spill]] }
 0x1ed   : >> { %v880_v33 = vstv %s3402_s4  ;;  %v878_v41 = vmul.f32 %v877_v32, %v2768_v54  ;;  %s3408_s12 = sld [smem:[#allocation92_spill]]  ;;  %v859_v47 = vadd.f32 %v858_v17, %v856_v39 }
 0x1ee   : >> { %v883_v35 = vstv %s3403_s5  ;;  %v876_v40 = vadd.f32 %v875_v30, %v873_v23  ;;  %s3409_s15 = sld [smem:[#allocation93_spill]]  ;;  %v881_v44 = vmul.f32 %v880_v33, %v2770_v57 }
 0x1ef   : >> { %v886_v36 = vstv %s3404_s6  ;;  %s3410_s0 = sld [smem:[#allocation94_spill]]  ;;  %v884_v49 = vmul.f32 %v883_v35, %v2775_v61  ;;  %v862_v59 = vadd.f32 %v861_v24, %v859_v47 }
 0x1f0   : >> { %v889_v45 = vstv %s3405_s8  ;;  %s3411_s2 = sld [smem:[#allocation95_spill]]  ;;  %v879_v48 = vadd.f32 %v878_v41, %v876_v40  ;;  %v887_v56 = vmul.f32 %v886_v36, %v2777_v1 }
 0x1f1   : >> { %s3412_s1 = sld [smem:[#allocation96_spill]]  ;;  %v869_v52 = vstv %s3406_s11  ;;  %v890_v62 = vmul.f32 %v889_v45, %v2790_v21  ;;  %v865_v6 = vadd.f32 %v864_v42, %v862_v59 }
 0x1f2   : >> { %s3413_s27 = sld [smem:[#allocation97_spill]]  ;;  %v892_v58 = vstv %s3407_s14  ;;  %v882_v60 = vadd.f32 %v881_v44, %v879_v48 }
 0x1f3   : >> { %s3414_s3 = sld [smem:[#allocation98_spill]]  ;;  %v895_v63 = vstv %s3408_s12  ;;  %v893_v2 = vmul.f32 %v892_v58, %v2798_v31  ;;  %v868_v13 = vadd.f32 %v867_v43, %v865_v6 }
 0x1f4   : >> { %s3415_s4 = sld [smem:[#allocation99_spill]]  ;;  %v898_v3 = vstv %s3409_s15  ;;  %v885_v7 = vadd.f32 %v884_v49, %v882_v60  ;;  %v896_v27 = vmul.f32 %v895_v63, %v2801_v34 }
 0x1f5   : >> { %s3416_s5 = sld [smem:[#allocation148_spill]]  ;;  %v904_v5 = vstv %s3410_s0  ;;  %v2919_v22 = vadd.f32 %v869_v52, %v868_v13  ;;  %v899_v23 = vmul.f32 %v898_v3, %v2805_v38 }
 0x1f6   : >> { %v906_v4 = vstv %s3411_s2  ;;  %s3417_s6 = sld [smem:[#allocation100_spill]]  ;;  %v905_v8 = vmul.f32 %v904_v5, %v2763_v50  ;;  %v888_v15 = vadd.f32 %v887_v56, %v885_v7 }
 0x1f7   : >> { %v907_v0 = vmul.f32 %v906_v4, %v2766_v53  ;;  %v909_v9 = vstv %s3412_s1  ;;  %s3418_s8 = sld [smem:[#allocation101_spill]]  ;;  %v871_v63 = vmax.f32 %v2919_v22, 0.0 }
 0x1f8   : >> { %v912_v10 = vstv %s3413_s27  ;;  %v910_v17 = vmul.f32 %v909_v9, %v2768_v54  ;;  %s3419_s11 = sld [smem:[#allocation102_spill]]  ;;  %v891_v26 = vadd.f32 %v890_v62, %v888_v15 }
 0x1f9   : >> { %v915_v11 = vstv %s3414_s3  ;;  %v908_v16 = vadd.f32 %v907_v0, %v905_v8  ;;  %s3420_s14 = sld [smem:[#allocation103_spill]]  ;;  %v913_v24 = vmul.f32 %v912_v10, %v2770_v57 }
 0x1fa   : >> { %v918_v12 = vstv %s3415_s4  ;;  %s3421_s12 = sld [smem:[#allocation104_spill]]  ;;  %v916_v29 = vmul.f32 %v915_v11, %v2775_v61  ;;  %v894_v33 = vadd.f32 %v893_v2, %v891_v26 }
 0x1fb   : >> { %v901_v20 = vstv %s3416_s5  ;;  %s3422_s15 = sld [smem:[#allocation105_spill]]  ;;  %v911_v28 = vadd.f32 %v910_v17, %v908_v16  ;;  %v919_v30 = vmul.f32 %v918_v12, %v2777_v1 }
 0x1fc   : >> { %v921_v25 = vstv %s3417_s6  ;;  %s3423_s0 = sld [smem:[#allocation106_spill]]  ;;  %v897_v43 = vadd.f32 %v896_v27, %v894_v33 }
 0x1fd   : >> { %s3424_s2 = sld [smem:[#allocation107_spill]]  ;;  %v924_v32 = vstv %s3418_s8  ;;  %v914_v35 = vadd.f32 %v913_v24, %v911_v28  ;;  %v922_v36 = vmul.f32 %v921_v25, %v2790_v21 }
 0x1fe   : >> { %s3425_s1 = sld [smem:[#allocation108_spill]]  ;;  %v927_v37 = vstv %s3419_s11  ;;  %v925_v39 = vmul.f32 %v924_v32, %v2798_v31  ;;  %v900_v58 = vadd.f32 %v899_v23, %v897_v43 }
 0x1ff   : >> { %s3426_s27 = sld [smem:[#allocation109_spill]]  ;;  %v930_v40 = vstv %s3420_s14  ;;  %v917_v44 = vadd.f32 %v916_v29, %v914_v35  ;;  %v928_v6 = vmul.f32 %v927_v37, %v2801_v34 }
 0x200   : >> { %s3427_s3 = sld [smem:[#allocation149_spill]]  ;;  %v936_v41 = vstv %s3421_s12  ;;  %v2943_v0 = vadd.f32 %v901_v20, %v900_v58  ;;  %v931_v9 = vmul.f32 %v930_v40, %v2805_v38 }
 0x201   : >> { %v938_v42 = vstv %s3422_s15  ;;  %s3428_s4 = sld [smem:[#allocation110_spill]]  ;;  %v937_v45 = vmul.f32 %v936_v41, %v2763_v50  ;;  %v920_v59 = vadd.f32 %v919_v30, %v917_v44 }
 0x202   : >> { %v939_v47 = vmul.f32 %v938_v42, %v2766_v53  ;;  %v941_v48 = vstv %s3423_s0  ;;  %s3429_s5 = sld [smem:[#allocation111_spill]]  ;;  %v903_v40 = vmax.f32 %v2943_v0, 0.0 }
 0x203   : >> { %v944_v49 = vstv %s3424_s2  ;;  %v942_v62 = vmul.f32 %v941_v48, %v2768_v54  ;;  %s3430_s6 = sld [smem:[#allocation112_spill]]  ;;  %v923_v4 = vadd.f32 %v922_v36, %v920_v59 }
 0x204   : >> { %v947_v52 = vstv %s3425_s1  ;;  %v940_v60 = vadd.f32 %v939_v47, %v937_v45  ;;  %s3431_s8 = sld [smem:[#allocation113_spill]]  ;;  %v945_v3 = vmul.f32 %v944_v49, %v2770_v57 }
 0x205   : >> { %v950_v56 = vstv %s3426_s27  ;;  %s3432_s11 = sld [smem:[#allocation114_spill]]  ;;  %v948_v8 = vmul.f32 %v947_v52, %v2775_v61  ;;  %v926_v12 = vadd.f32 %v925_v39, %v923_v4 }
 0x206   : >> { %v933_v2 = vstv %s3427_s3  ;;  %s3433_s14 = sld [smem:[#allocation115_spill]]  ;;  %v943_v7 = vadd.f32 %v942_v62, %v940_v60  ;;  %v951_v10 = vmul.f32 %v950_v56, %v2777_v1 }
 0x207   : >> { %v953_v5 = vstv %s3428_s4  ;;  %s3434_s12 = sld [smem:[#allocation116_spill]]  ;;  %v929_v26 = vadd.f32 %v928_v6, %v926_v12 }
 0x208   : >> { %s3435_s15 = sld [smem:[#allocation117_spill]]  ;;  %v956_v11 = vstv %s3429_s5  ;;  %v946_v13 = vadd.f32 %v945_v3, %v943_v7  ;;  %v954_v15 = vmul.f32 %v953_v5, %v2790_v21 }
 0x209   : >> { %s3436_s0 = sld [smem:[#allocation118_spill]]  ;;  %v959_v16 = vstv %s3430_s6  ;;  %v957_v17 = vmul.f32 %v956_v11, %v2798_v31  ;;  %v932_v35 = vadd.f32 %v931_v9, %v929_v26 }
 0x20a   : >> { %s3437_s2 = sld [smem:[#allocation119_spill]]  ;;  %v962_v24 = vstv %s3431_s8  ;;  %v949_v27 = vadd.f32 %v948_v8, %v946_v13  ;;  %v960_v45 = vmul.f32 %v959_v16, %v2801_v34 }
 0x20b   : >> { %s3438_s1 = sld [smem:[#allocation150_spill]]  ;;  %v968_v20 = vstv %s3432_s11  ;;  %v2967_v49 = vadd.f32 %v933_v2, %v932_v35  ;;  %v963_v52 = vmul.f32 %v962_v24, %v2805_v38 }
 0x20c   : >> { %v970_v25 = vstv %s3433_s14  ;;  %s3439_s27 = sld [smem:[#allocation120_spill]]  ;;  %v969_v28 = vmul.f32 %v968_v20, %v2763_v50  ;;  %v952_v36 = vadd.f32 %v951_v10, %v949_v27 }
 0x20d   : >> { %v971_v29 = vmul.f32 %v970_v25, %v2766_v53  ;;  %v973_v23 = vstv %s3434_s12  ;;  %s3440_s3 = sld [smem:[#allocation121_spill]]  ;;  %v935_v25 = vmax.f32 %v2967_v49, 0.0 }
 0x20e   : >> { %v976_v30 = vstv %s3435_s15  ;;  %v974_v39 = vmul.f32 %v973_v23, %v2768_v54  ;;  %s3441_s4 = sld [smem:[#allocation122_spill]]  ;;  %v955_v44 = vadd.f32 %v954_v15, %v952_v36 }
 0x20f   : >> { %v979_v32 = vstv %s3436_s0  ;;  %v972_v37 = vadd.f32 %v971_v29, %v969_v28  ;;  %s3442_s5 = sld [smem:[#allocation123_spill]]  ;;  %v977_v42 = vmul.f32 %v976_v30, %v2770_v57 }
 0x210   : >> { %v982_v33 = vstv %s3437_s2  ;;  %s3443_s6 = sld [smem:[#allocation124_spill]]  ;;  %v980_v48 = vmul.f32 %v979_v32, %v2775_v61  ;;  %v958_v59 = vadd.f32 %v957_v17, %v955_v44 }
 0x211   : >> { %v965_v41 = vstv %s3438_s1  ;;  %s3444_s8 = sld [smem:[#allocation125_spill]]  ;;  %v975_v47 = vadd.f32 %v974_v39, %v972_v37  ;;  %v983_v56 = vmul.f32 %v982_v33, %v2777_v1 }
 0x212   : >> { %v985_v43 = vstv %s3439_s27  ;;  %s3445_s11 = sld [smem:[#allocation126_spill]]  ;;  %v961_v7 = vadd.f32 %v960_v45, %v958_v59 }
 0x213   : >> { %s3446_s14 = sld [smem:[#allocation127_spill]]  ;;  %v988_v58 = vstv %s3440_s3  ;;  %v978_v60 = vadd.f32 %v977_v42, %v975_v47  ;;  %v986_v62 = vmul.f32 %v985_v43, %v2790_v21 }
 0x214   : >> { %s3447_s12 = sld [smem:[#allocation128_spill]]  ;;  %v991_v3 = vstv %s3441_s4  ;;  %v989_v5 = vmul.f32 %v988_v58, %v2798_v31  ;;  %v964_v16 = vadd.f32 %v963_v52, %v961_v7 }
 0x215   : >> { %s3448_s15 = sld [smem:[#allocation129_spill]]  ;;  %v994_v4 = vstv %s3442_s5  ;;  %v981_v8 = vadd.f32 %v980_v48, %v978_v60  ;;  %v992_v23 = vmul.f32 %v991_v3, %v2801_v34 }
 0x216   : >> { %s3449_s0 = sld [smem:[#allocation151_spill]]  ;;  %v1000_v2 = vstv %s3443_s6  ;;  %v2991_v33 = vadd.f32 %v965_v41, %v964_v16  ;;  %v995_v35 = vmul.f32 %v994_v4, %v2805_v38 }
 0x217   : >> { %v1002_v6 = vstv %s3444_s8  ;;  %s3450_s2 = sld [smem:[#allocation130_spill]]  ;;  %v1001_v9 = vmul.f32 %v1000_v2, %v2763_v50  ;;  %v984_v17 = vadd.f32 %v983_v56, %v981_v8 }
 0x218   : >> { %v1003_v10 = vmul.f32 %v1002_v6, %v2766_v53  ;;  %v1005_v11 = vstv %s3445_s11  ;;  %s3451_s1 = sld [smem:[#allocation131_spill]]  ;;  %v967_v8 = vmax.f32 %v2991_v33, 0.0 }
 0x219   : >> { %v1008_v12 = vstv %s3446_s14  ;;  %v1006_v20 = vmul.f32 %v1005_v11, %v2768_v54  ;;  %s3452_s27 = sld [smem:[#allocation132_spill]]  ;;  %v987_v29 = vadd.f32 %v986_v62, %v984_v17 }
 0x21a   : >> { %v1011_v13 = vstv %s3447_s12  ;;  %v1004_v24 = vadd.f32 %v1003_v10, %v1001_v9  ;;  %s3453_s3 = sld [smem:[#allocation133_spill]]  ;;  %v1009_v27 = vmul.f32 %v1008_v12, %v2770_v57 }
 0x21b   : >> { %v1014_v15 = vstv %s3448_s15  ;;  %s3454_s4 = sld [smem:[#allocation134_spill]]  ;;  %v1012_v32 = vmul.f32 %v1011_v13, %v2775_v61  ;;  %v990_v39 = vadd.f32 %v989_v5, %v987_v29 }
 0x21c   : >> { %v997_v26 = vstv %s3449_s0  ;;  %s3455_s5 = sld [smem:[#allocation135_spill]]  ;;  %v1007_v30 = vadd.f32 %v1006_v20, %v1004_v24  ;;  %v1015_v36 = vmul.f32 %v1014_v15, %v2777_v1 }
 0x21d   : >> { %v1017_v28 = vstv %s3450_s2  ;;  %s3456_s6 = sld [smem:[#allocation136_spill]]  ;;  %v993_v52 = vadd.f32 %v992_v23, %v990_v39 }
 0x21e   : >> { %s3457_s8 = sld [smem:[#allocation137_spill]]  ;;  %v1020_v37 = vstv %s3451_s1  ;;  %v1010_v42 = vadd.f32 %v1009_v27, %v1007_v30  ;;  %v1018_v43 = vmul.f32 %v1017_v28, %v2790_v21 }
 0x21f   : >> { %s3458_s11 = sld [smem:[#allocation138_spill]]  ;;  %v1023_v44 = vstv %s3452_s27  ;;  %v1021_v45 = vmul.f32 %v1020_v37, %v2798_v31  ;;  %v996_v4 = vadd.f32 %v995_v35, %v993_v52 }
 0x220   : >> { %s3459_s14 = sld [smem:[#allocation139_spill]]  ;;  %v1026_v47 = vstv %s3453_s3  ;;  %v1013_v56 = vadd.f32 %v1012_v32, %v1010_v42  ;;  %v1024_v11 = vmul.f32 %v1023_v44, %v2801_v34 }
 0x221   : >> { %s3460_s12 = sld [smem:[#allocation152_spill]]  ;;  %v1032_v41 = vstv %s3454_s4  ;;  %v3015_v15 = vadd.f32 %v997_v26, %v996_v4 }
 0x222   : >> { %v1034_v48 = vstv %s3455_s5  ;;  %s3461_s15 = sld [smem:[#allocation140_spill]]  ;;  %v1033_v58 = vmul.f32 %v1032_v41, %v2763_v50  ;;  %v1016_v2 = vadd.f32 %v1015_v36, %v1013_v56 }
 0x223   : >> { %v1035_v59 = vmul.f32 %v1034_v48, %v2766_v53  ;;  %v1037_v60 = vstv %s3456_s6  ;;  %s3462_s0 = sld [smem:[#allocation141_spill]] }
 0x224   : >> { %v1040_v62 = vstv %s3457_s8  ;;  %v1038_v7 = vmul.f32 %v1037_v60, %v2768_v54  ;;  %s3463_s2 = sld [smem:[#allocation142_spill]]  ;;  %v1019_v53 = vadd.f32 %v1018_v43, %v1016_v2  ;;  %v1027_v54 = vmul.f32 %v1026_v47, %v2805_v38 }
 0x225   : >> { %v1043_v3 = vstv %s3458_s11  ;;  %v1036_v6 = vadd.f32 %v1035_v59, %v1033_v58  ;;  %s3464_s1 = sld [smem:[#allocation143_spill]]  ;;  %v1041_v10 = vmul.f32 %v1040_v62, %v2770_v57  ;;  %v999_v58 = vmax.f32 %v3015_v15, 0.0 }
 0x226   : >> { %v1046_v5 = vstv %s3459_s14  ;;  %s3465_s27 = sld [smem:[#allocation154_spill]]  ;;  %v1044_v13 = vmul.f32 %v1043_v3, %v2775_v61  ;;  %v1022_v57 = vadd.f32 %v1021_v45, %v1019_v53 }
 0x227   : >> { %v1029_v9 = vstv %s3460_s12  ;;  %s3466_s3 = sld [smem:[#allocation155_spill]]  ;;  %v1039_v12 = vadd.f32 %v1038_v7, %v1036_v6  ;;  %v1047_v16 = vmul.f32 %v1046_v5, %v2777_v1 }
 0x228   : >> { %v1049_v50 = vstv %s3461_s15  ;;  %s3467_s4 = sld [smem:[#allocation156_spill]]  ;;  %v1025_v23 = vadd.f32 %v1024_v11, %v1022_v57 }
 0x229   : >> { %s3468_s5 = sld [smem:[#allocation157_spill]]  ;;  %v1052_v17 = vstv %s3462_s0  ;;  %v1042_v24 = vadd.f32 %v1041_v10, %v1039_v12  ;;  %v1050_v20 = vmul.f32 %v1049_v50, %v2790_v21  ;;  %v1106_v50 = vstv %s2713_s9 }
 0x22a   : >> { %s3469_s6 = sld [smem:[#allocation158_spill]]  ;;  %v1055_v27 = vstv %s3463_s2  ;;  %v1053_v28 = vmul.f32 %v1052_v17, %v2798_v31  ;;  %v1028_v21 = vadd.f32 %v1027_v54, %v1025_v23  ;;  %v1109_v17 = vstv %s2715_s19 }
 0x22b   : >> { %s3470_s8 = sld [smem:[#allocation159_spill]]  ;;  %v1058_v29 = vstv %s3464_s1  ;;  %v1045_v30 = vadd.f32 %v1044_v13, %v1042_v24  ;;  %v1056_v44 = vmul.f32 %v1055_v27, %v2801_v34  ;;  %v1107_v55 = vmul.f32 %v1106_v50, %v871_v63 }
 0x22c   : >> { %v1064_v61 = vstv %s3465_s27  ;;  %s3471_s11 = sld [smem:[#allocation160_spill]]  ;;  %v1030_v41 = vadd.f32 %v1029_v9, %v1028_v21  ;;  %v1059_v59 = vmul.f32 %v1058_v29, %v2805_v38  ;;  %v1112_v27 = vstv %s2717_s13 }
 0x22d   : >> { %v1066_v26 = vstv %s3466_s3  ;;  %v1065_v32 = vmul.f32 %v1064_v61, %v775_v14  ;;  %v1048_v42 = vadd.f32 %v1047_v16, %v1045_v30  ;;  %s3472_s14 = sld [smem:[#allocation161_spill]]  ;;  %v1110_v51 = vmul.f32 %v1109_v17, %v903_v40 }
 0x22e   : >> { %v1067_v1 = vmul.f32 %v1066_v26, %v807_v46  ;;  %v1069_v35 = vstv %s3467_s4  ;;  %s3473_s12 = sld [smem:[#allocation164_spill]]  ;;  %v1031_v4 = vmax.f32 %v1030_v41, 0.0  ;;  %v1115_v29 = vstv %s2719_s22 }
 0x22f   : >> { %v1072_v36 = vstv %s3468_s5  ;;  %v1070_v43 = vmul.f32 %v1069_v35, %v839_v19  ;;  %s3474_s15 = sld [smem:[#allocation165_spill]]  ;;  %v1051_v48 = vadd.f32 %v1050_v20, %v1048_v42  ;;  %v1118_v23 = vstv %s2721_s28 }
 0x230   : >> { %v1075_v37 = vstv %s3469_s6  ;;  %v1068_v31 = vadd.f32 %v1067_v1, %v1065_v32  ;;  %v1073_v45 = vmul.f32 %v1072_v36, %v871_v63  ;;  %s3475_s0 = sld [smem:[#allocation166_spill]]  ;;  %v1113_v63 = vmul.f32 %v1112_v27, %v935_v25  ;;  %s3482_s6 = sshll.u32 %s2165_s26, 3 }
 0x231   : >> { %v1078_v39 = vstv %s3470_s8  ;;  %v1076_v56 = vmul.f32 %v1075_v37, %v903_v40  ;;  %s3476_s2 = sld [smem:[#allocation153_spill]]  ;;  %v1054_v60 = vadd.f32 %v1053_v28, %v1051_v48  ;;  %v1093_v30 = vstv %s2727_s10  ;;  %s657_s26 = sadd.s32 1, %s2165_s26  }
 0x232   : >> { %v1081_v47 = vstv %s3471_s11  ;;  %v1071_v52 = vadd.f32 %v1070_v43, %v1068_v31  ;;  %s3477_s1 = sld [smem:[#allocation162_spill]]  ;;  %v1079_v34 = vmul.f32 %v1078_v39, %v935_v25  ;;  %v1116_v0 = vmul.f32 %v1115_v29, %v967_v8  ;;  %p654_p8 = scmp.ge.s32.totalorder %s657_s26, 2  }
 0x233   : >> { %v1082_v3 = vmul.f32 %v1081_v47, %v967_v8  ;;  %v1084_v5 = vstv %s3472_s14  ;;  %v1057_v9 = vadd.f32 %v1056_v44, %v1054_v60  ;;  %s3478_s27 = sld [smem:[#allocation163_spill]]  ;;  %v1121_v1 = vstv %s2723_s7 }
 0x234   : >> { %v1074_v62 = vadd.f32 %v1073_v45, %v1071_v52  ;;  %v1098_v2 = vstv %s3473_s12  ;;  %v1085_v16 = vmul.f32 %v1084_v5, %v999_v58  ;;  %s3479_s3 = sld [smem:[#allocation167_spill]]  ;;  %v1119_v36 = vmul.f32 %v1118_v23, %v999_v58 }
 0x235   : >> { %v1100_v6 = vstv %s3474_s15  ;;  %v1099_v38 = vmul.f32 %v1098_v2, %v775_v14  ;;  %v1060_v15 = vadd.f32 %v1059_v59, %v1057_v9  ;;  %s3480_s4 = sld [smem:[#allocation169_spill]]  ;;  %v1122_v49 = vmul.f32 %v1121_v1, %v1031_v4 }
 0x236   : >> { %v1103_v7 = vstv %s3475_s0  ;;  %v1077_v10 = vadd.f32 %v1076_v56, %v1074_v62  ;;  %v1101_v12 = vmul.f32 %v1100_v6, %v807_v46  ;;  %s3481_s5 = sld [smem:[#allocation168_spill]] }
 0x237   : >> { %v1061_v53 = vstv %s3476_s2  ;;  %v1104_v13 = vmul.f32 %v1103_v7, %v839_v19 }
 0x238   : >> { %v1087_v11 = vstv %s3477_s1  ;;  %v1080_v54 = vadd.f32 %v1079_v34, %v1077_v10  ;;  %v1102_v57 = vadd.f32 %v1101_v12, %v1099_v38  ;;  %v1062_v14 = vadd.f32 %v1061_v53, %v1060_v15 }
 0x239   : >> { %v1088_v20 = vmul.f32 %v1087_v11, %v1031_v4  ;;  %v1090_v18 = vstv %s3478_s27 }
 0x23a   : >> { %v1083_v24 = vadd.f32 %v1082_v3, %v1080_v54  ;;  %v1105_v46 = vadd.f32 %v1104_v13, %v1102_v57  ;;  %v1063_v19 = vmax.f32 %v1062_v14, 0.0  ;;  %v1124_v39 = vstv %s3479_s3 }
 0x23b   : >> { %s1096_s8 = scalar_lea.vmem %s3480_s4, %s3482_s6 }
 0x23c   : >> { %v1086_v28 = vadd.f32 %v1085_v16, %v1083_v24  ;;  %v1108_v22 = vadd.f32 %v1107_v55, %v1105_v46  ;;  %v1091_v26 = vmul.f32 %v1090_v18, %v1063_v19  ;;  %v1125_v31 = vmul.f32 %v1124_v39, %v1063_v19 }
 0x23d   : >> { %v1127_v44 = vstv %s3481_s5 }
 0x23e   : >> { %v1089_v61 = vadd.f32 %v1088_v20, %v1086_v28  ;;  %v1111_v32 = vadd.f32 %v1110_v51, %v1108_v22 }
 0x240   : >> { %v1092_v40 = vadd.f32 %v1091_v26, %v1089_v61  ;;  %v1114_v35 = vadd.f32 %v1113_v63, %v1111_v32 }
 0x242   : >> { %v1094_v37 = vadd.f32 %v1093_v30, %v1092_v40  ;;  %v1117_v21 = vadd.f32 %v1116_v0, %v1114_v35 }
 0x244   : >> { %v1095_v25 = vmax.f32 %v1094_v37, 0.0  ;;  %v1120_v42 = vadd.f32 %v1119_v36, %v1117_v21 }
 0x246   : >> { %1097 = vst [vmem:[%s1096_s8] sm:$0xff] %v1095_v25  ;;  %v1123_v43 = vadd.f32 %v1122_v49, %v1120_v42 }
 0x248   : >> { %v1126_v45 = vadd.f32 %v1125_v31, %v1123_v43 }
 0x24a   : >> { %v1128_v33 = vadd.f32 %v1127_v44, %v1126_v45  ;;  %656 = sbr.rel (!%p654_p8) target bundleno = 420 (0x1a4), region = 261 }
 0x24c   : >> { %v1129_v47 = vmax.f32 %v1128_v33, 0.0 }
 0x24e   : >> { %1686 = vst [vmem:[%s1096_s8 + $0x10] sm:$0xff] %v1129_v47 }
 0x24f   : > { %1138 = sbr.rel (!%p2282_p5) target bundleno = 641 (0x281), region = 135  ;;  %s3484_s14 = sld [smem:[#allocation19_spill]] (%p2282_p5) }
 0x250   : > { %s3485_s27 = sld [smem:[#allocation177_spill]] (%p2282_p5) }
 0x255   : > { %s1688_s12 = sshll.u32 %s3484_s14, 1  ;;  %s1707_s15 = sshll.u32 %s3484_s14, 4 }
 0x256   : > { %s1140_s0 = ssub.s32 3, %s1688_s12  ;;  %s3091_s3 = scalar_lea.vmem %s3485_s27, %s1707_s15  }
 0x257   : > { %p1141_p9 = scmp.lt.s32.totalorder %s1140_s0, 2 }
 0x259   : > { %s3501_s0 = smov (!%p1141_p9, %s1140_s0), 2 }
 0x25a   : > { %s1689_s4 = sshll.u32 %s3501_s0, 4 }
 0x25b   : > { %p1692_p10 = scmp.eq.s32.totalorder %s1689_s4, 0 }
 0x25c   : > { %s3097_s7 = sshrl.u32 (!%p1692_p10), %s3501_s0, 1 }
 0x25d   : > { %1149 = sbr.rel (%p1692_p10) target bundleno = 641 (0x281), region = 139  ;;  %p1693_p5 = scmp.le.s32.totalorder (!%p1692_p10), %s3097_s7, 0 }
 0x262   : > { %1395 = sbr.rel (%p1693_p5) target bundleno = 625 (0x271), region = 266  ;;  %s3486_s25 = sld [smem:[#allocation169_spill]] (!%p1693_p5) }
 0x263   : > { %s3487_s28 = smov (!%p1693_p5), %s3091_s3  ;;  %s3106_s10 = smov (!%p1693_p5), 0  }
 0x264   : > { %s2179_s26 = smov (!%p1693_p5), 0  }
 0x267 LB: >> { %s3488_s24 = sld [smem:[#allocation169_spill]]  ;;  %v1220_v8 = vld [vmem:[%s2173_s25] sm:$0xff]  ;;  %v1222_v41 = vld [vmem:[%s2173_s25 + $0x8] sm:$0xff]  ;;  %v1224_v48 = vld [vmem:[%s2173_s25 + $0x10] sm:$0xff]  ;;  %s1228_s17 = sadd.s32 1, %s2177_s10  ;;  %s2181_s26 = sphi %s2179_s26, %s1214_s26   ;;  %s2177_s10 = sphi %s3106_s10, %s3489_s10   ;;  %s2173_s25 = sphi %s3486_s25, %s1233_s25   ;;  %s2169_s28 = sphi %s3487_s28, %s1234_s28  }
 0x268   : >> { %1221 = vst [vmem:[%s2169_s28] sm:$0xff] %v1220_v8  ;;  %v1226_v52 = vld [vmem:[%s2173_s25 + $0x18] sm:$0xff]  ;;  %p1229_p11 = scmp.ge.s32.totalorder %s1228_s17, %s3097_s7  ;;  %s1214_s26 = sadd.s32 1, %s2181_s26  }
 0x269   : >> { %1223 = vst [vmem:[%s2169_s28 + $0x8] sm:$0xff] %v1222_v41  ;;  %p1213_p12 = scmp.ge.s32.totalorder %s1214_s26, %s3097_s7 }
 0x26a   : >> { %1225 = vst [vmem:[%s2169_s28 + $0x18] sm:$0xff] %v1224_v48  ;;  %s3503_s17 = smov (%p1229_p11, %s1228_s17), 0 }
 0x26b   : >> { %1227 = vst [vmem:[%s2169_s28 + $0x20] sm:$0xff] %v1226_v52  ;;  %s1694_s23 = sshll.u32 %s3503_s17, 4  ;;  %s3489_s10 = smov %s3503_s17 }
 0x26c   : >> { %s1234_s28 = scalar_lea.vmem %s3091_s3, %s1694_s23   ;;  %1216 = sbr.rel (!%p1213_p12) target bundleno = 615 (0x267), region = 272 }
 0x26d   : >> { %s1233_s25 = scalar_lea.vmem %s3488_s24, %s1694_s23  }
 0x271 PF: > { %s3490_s29 = sld [smem:[#allocation169_spill]]  ;;  %s3122_s30 = sand.u32 1, %s3501_s0  }
 0x272   : > { %s1708_s21 = sshll.u32 %s3097_s7, 4  ;;  %p1699_p13 = scmp.le.s32.totalorder %s3122_s30, 0 }
 0x273   : > { %s1241_s18 = scalar_lea.vmem %s3091_s3, %s1708_s21   ;;  %s2191_s13 = smov (!%p1699_p13), 0  }
 0x274   : > { %1409 = sbr.rel (%p1699_p13) target bundleno = 641 (0x281), region = 277  ;;  %s2183_s20 = smov (!%p1699_p13), %s1241_s18  }
 0x275   : > { %s2195_s19 = smov (!%p1699_p13), 0  }
 0x277   : > { %s3126_s16 = scalar_lea.vmem %s3490_s29, %s1708_s21  }
 0x278   : > { %s2187_s22 = smov (!%p1699_p13), %s3126_s16  }
 0x279 LB: >> { %v1251_v56 = vld [vmem:[%s2189_s22] sm:$0xff]  ;;  %v1253_v58 = vld [vmem:[%s2189_s22 + $0x10] sm:$0xff]  ;;  %s1255_s9 = sadd.s32 1, %s2193_s13  ;;  %s1245_s19 = sadd.s32 1, %s2197_s19   ;;  %s2197_s19 = sphi %s2195_s19, %s1245_s19   ;;  %s2193_s13 = sphi %s2191_s13, %s2192_s13   ;;  %s2189_s22 = sphi %s2187_s22, %s1260_s22   ;;  %s2185_s20 = sphi %s2183_s20, %s1261_s20  }
 0x27a   : >> { %1252 = vst [vmem:[%s2185_s20] sm:$0xff] %v1251_v56  ;;  %p1256_p0 = scmp.ge.s32.totalorder %s1255_s9, %s3122_s30  ;;  %p1244_p1 = scmp.ge.s32.totalorder %s1245_s19, %s3122_s30 }
 0x27b   : >> { %1254 = vst [vmem:[%s2185_s20 + $0x18] sm:$0xff] %v1253_v58 }
 0x27c   : >> { %s3505_s9 = smov (%p1256_p0, %s1255_s9), 0  ;;  %1247 = sbr.rel (!%p1244_p1) target bundleno = 633 (0x279), region = 283 }
 0x27d   : >> { %s1700_s5 = sshll.u32 %s3505_s9, 3  ;;  %s2192_s13 = smov %s3505_s9  }
 0x27e   : >> { %s1260_s22 = scalar_lea.vmem %s3126_s16, %s1700_s5   ;;  %s1261_s20 = scalar_lea.vmem %s1241_s18, %s1700_s5  }
 0x281 PF: > { %s3491_s26 = sld [smem:[#allocation20_spill]] }
 0x282   : > { %s3492_s24 = sld [smem:[#allocation18_spill]] }
 0x283   : > { %s3493_s25 = sld [smem:[#allocation21_spill]] }
 0x287   : > { %p18_p2 = scmp.ge.s32.totalorder %s3491_s26, 4  }
 0x289   :  { %20 = sbr.rel (!%p18_p2) target bundleno = 14 (0xe), region = 294 }
 0x28e   :  { %1277 = vsyncpa [#allocation4], 1 }
 0x28f   :  { %1279 = vsyncpa [#allocation4 + $0x1], 1 }
 0x290   :  { %1280 = vsyncpa [#allocation6], 1 }
 0x291   :  { %1281 = vsyncpa [#allocation9], 1 }
 0x292   :  { %1282 = vsyncpa [#allocation12], 1 }

</bundles_post_ra>
